<compile_context>
chip_gen: v7x
topology: tpu7x:2x2x1
jax: 0.10.0
libtpu: 0.0.40
codegen_flags: <defaults>
</compile_context>

<pallas_src>
import functools

import jax
import jax.numpy as jnp
from jax.experimental import pallas as pl
from jax.experimental.pallas import tpu as pltpu


# ----------------------------------------------------------------------------
# Fused conv3x3(dilated) + BatchNorm(scale/shift) + ReLU kernel
# ----------------------------------------------------------------------------
def _rebnconv_kernel(x_ref, w_ref, scale_ref, shift_ref, o_ref, pad_ref,
                     *, W, Cin, Cout, d, TH):
    r = pl.program_id(1)                       # output row-strip index
    R = pl.num_programs(1)
    row0 = pl.multiple_of(r * TH, TH)          # first output row of this strip
    cdt = pad_ref.dtype                        # bf16

    # ---- strip-sized halo scratch: zero only the out-of-image borders -------
    # Left / right column borders are always outside the image.
    pad_ref[:, 0:d, :] = jnp.zeros((TH + 2 * d, d, Cin), cdt)
    pad_ref[:, W + d:W + 2 * d, :] = jnp.zeros((TH + 2 * d, d, Cin), cdt)

    @pl.when(r == 0)
    def _():                                   # top halo falls above the image
        pad_ref[0:d, :, :] = jnp.zeros((d, W + 2 * d, Cin), cdt)

    @pl.when(r == R - 1)
    def _():                                   # bottom halo falls below image
        pad_ref[TH + d:TH + 2 * d, :, :] = jnp.zeros((d, W + 2 * d, Cin), cdt)

    # Core rows of this strip (always inside the image); cast to bf16 ONCE here.
    pad_ref[d:d + TH, d:d + W, :] = x_ref[pl.ds(row0, TH), :, :].astype(cdt)

    @pl.when(r > 0)
    def _():                                   # top halo rows exist in image
        pad_ref[0:d, d:d + W, :] = x_ref[pl.ds(row0 - d, d), :, :].astype(cdt)

    @pl.when(r < R - 1)
    def _():                                   # bottom halo rows exist in image
        pad_ref[TH + d:TH + 2 * d, d:d + W, :] = (
            x_ref[pl.ds(row0 + TH, d), :, :].astype(cdt))

    # ---- im2col: 3 dx-shifted views, 9 row-window taps, ONE MXU matmul ------
    # Only the 3 column shifts materialize copies; the dy windows are cheap
    # leading-dim slices of those.
    cols = [pad_ref[:, dx * d:dx * d + W, :] for dx in range(3)]   # (TH+2d,W,Cin)
    taps = [cols[dx][dy * d:dy * d + TH].reshape(TH * W, Cin)      # (TH*W, Cin)
            for dy in range(3) for dx in range(3)]
    im2col = jnp.concatenate(taps, axis=-1)                        # (TH*W, 9*Cin)

    acc = jnp.dot(im2col, w_ref[...],
                  preferred_element_type=jnp.float32)              # (TH*W, Cout)

    # ---- fused BatchNorm (inference scale/shift) + ReLU ---------------------
    acc = jnp.maximum(acc * scale_ref[...] + shift_ref[...], 0.0)
    o_ref[...] = acc.reshape(TH, W, Cout).astype(o_ref.dtype)


def _pick_row_tile(H, W, Cout, d, *, acc_budget_bytes=128 * 1024):
    """Row-tile: multiple of 8 (legal output block), >= d (halo in-bounds),
    f32 accumulator TH*W*Cout*4 within budget, largest such divisor of H."""
    cands = [t for t in range(8, H, 8) if H % t == 0 and t >= d]
    if not cands:
        return H                       # single strip; block == full dim is legal
    fitting = [t for t in cands if t * W * Cout * 4 <= acc_budget_bytes]
    pool = fitting if fitting else [min(cands)]
    return max(pool)


def rebnconv(x, w_hwio, b, gamma, beta, running_mean, running_var,
             *, dirate=1, eps=1e-5, row_tile=None):
    """Fused REBNCONV forward: relu(bn(conv3x3_dilated(x))).  NHWC in/out.

    Note: activations/weights are fed to the MXU in bf16 (f32 accumulation), so
    results differ from PyTorch's f32 conv at ~1e-2 level (inference-grade)."""
    N, H, W, Cin = x.shape
    kh, kw, wcin, Cout = w_hwio.shape
    assert (kh, kw) == (3, 3) and wcin == Cin
    d = int(dirate)

    TH = _pick_row_tile(H, W, Cout, d) if row_tile is None else int(row_tile)
    assert H % TH == 0
    R = H // TH
    assert R == 1 or TH >= d, "halo rows must fit inside the neighbouring strip"
    assert TH % 8 == 0 or TH == H, "output block row dim must be 8-aligned"

    # Fold BN (eval mode) + conv bias into per-channel scale/shift (host side):
    #   y = conv(x, w) * scale + shift
    #   scale = gamma / sqrt(var + eps);  shift = (b - mean) * scale + beta
    scale = (gamma / jnp.sqrt(running_var + eps)).astype(jnp.float32)
    shift = ((b - running_mean) * scale + beta).astype(jnp.float32)

    # Pre-pack weights: HWIO -> (9*Cin, Cout) bf16 im2col matrix, tap-major
    # (dy, dx, cin) order matching the kernel's concatenation order.
    w_packed = w_hwio.reshape(9 * Cin, Cout).astype(jnp.bfloat16)

    kernel = functools.partial(_rebnconv_kernel, W=W, Cin=Cin, Cout=Cout,
                               d=d, TH=TH)

    return pl.pallas_call(
        kernel,
        out_shape=jax.ShapeDtypeStruct((N, H, W, Cout), x.dtype),
        grid=(N, R),
        in_specs=[
            # Whole image per batch element; block index independent of r, so
            # it is DMA'd once per image (r is the inner grid axis).
            pl.BlockSpec((None, H, W, Cin), lambda n, r: (n, 0, 0, 0)),
            pl.BlockSpec((9 * Cin, Cout), lambda n, r: (0, 0)),
            pl.BlockSpec((1, Cout), lambda n, r: (0, 0)),
            pl.BlockSpec((1, Cout), lambda n, r: (0, 0)),
        ],
        out_specs=pl.BlockSpec((None, TH, W, Cout), lambda n, r: (n, r, 0, 0)),
        scratch_shapes=[
            pltpu.VMEM((TH + 2 * d, W + 2 * d, Cin), jnp.bfloat16)],
        compiler_params=pltpu.CompilerParams(
            dimension_semantics=("parallel", "parallel")),
    )(x, w_packed, scale.reshape(1, Cout), shift.reshape(1, Cout))


# ----------------------------------------------------------------------------
# Pure-JAX reference (mirrors the PyTorch module in eval mode)
# ----------------------------------------------------------------------------
def rebnconv_reference(x, w_hwio, b, gamma, beta, running_mean, running_var,
                       *, dirate=1, eps=1e-5):
    y = jax.lax.conv_general_dilated(
        x, w_hwio, window_strides=(1, 1),
        padding=[(dirate, dirate), (dirate, dirate)],
        rhs_dilation=(dirate, dirate),
        dimension_numbers=("NHWC", "HWIO", "NHWC"))
    y = y + b
    y = (y - running_mean) / jnp.sqrt(running_var + eps) * gamma + beta
    return jnp.maximum(y, 0.0)


# ----------------------------------------------------------------------------
# Deterministic synthetic parameters (shapes follow nn.Conv2d / nn.BatchNorm2d)
# ----------------------------------------------------------------------------
def _init_params(key, Cin, Cout):
    ks = jax.random.split(key, 6)
    w = jax.random.normal(ks[0], (3, 3, Cin, Cout), jnp.float32) * 0.05
    b = jax.random.normal(ks[1], (Cout,), jnp.float32) * 0.05
    gamma = 1.0 + 0.1 * jax.random.normal(ks[2], (Cout,), jnp.float32)
    beta = 0.1 * jax.random.normal(ks[3], (Cout,), jnp.float32)
    mean = 0.1 * jax.random.normal(ks[4], (Cout,), jnp.float32)
    var = 0.8 + 0.4 * jax.random.uniform(ks[5], (Cout,), jnp.float32)
    return w, b, gamma, beta, mean, var


if __name__ == "__main__":
    key = jax.random.PRNGKey(0)
    kx1, kp1, kx2, kp2 = jax.random.split(key, 4)

    # Case 1: default dirate=1.
    N, H, W, Cin, Cout = 2, 16, 16, 16, 32
    x = jax.random.normal(kx1, (N, H, W, Cin), jnp.float32)
    params = _init_params(kp1, Cin, Cout)
    out = jax.block_until_ready(rebnconv(x, *params, dirate=1))
    ref = jax.block_until_ready(rebnconv_reference(x, *params, dirate=1))
    assert out.shape == (N, H, W, Cout)
    # bf16 MXU inputs with f32 accumulation -> relaxed tolerance vs f32 reference.
    assert jnp.allclose(out, ref, atol=5e-2, rtol=5e-2), (
        float(jnp.max(jnp.abs(out - ref))))

    # Case 2: dilated variant (dirate=2), different channel counts.
    Cin2, Cout2 = 8, 16
    x2 = jax.random.normal(kx2, (1, H, W, Cin2), jnp.float32)
    params2 = _init_params(kp2, Cin2, Cout2)
    out2 = jax.block_until_ready(rebnconv(x2, *params2, dirate=2))
    ref2 = jax.block_until_ready(rebnconv_reference(x2, *params2, dirate=2))
    assert out2.shape == (1, H, W, Cout2)
    assert jnp.allclose(out2, ref2, atol=5e-2, rtol=5e-2), (
        float(jnp.max(jnp.abs(out2 - ref2))))

    print("KERNEL_OK")
</pallas_src>

<mosaic_0001>
module attributes {stable_mosaic.version = 11 : i64} {
  func.func @_rebnconv_kernel(%arg0: i32, %arg1: i32, %arg2: memref<1x16x16x16xf32, #tpu.memory_space<vmem>>, %arg3: memref<144x32xbf16, #tpu.memory_space<vmem>>, %arg4: memref<1x32xf32, #tpu.memory_space<vmem>>, %arg5: memref<1x32xf32, #tpu.memory_space<vmem>>, %arg6: memref<1x8x16x32xf32, #tpu.memory_space<vmem>>, %arg7: memref<10x18x16xbf16, #tpu.memory_space<vmem>>) attributes {dimension_semantics = [#tpu.dimension_semantics<parallel>, #tpu.dimension_semantics<parallel>], iteration_bounds = array<i64: 2, 2>, scalar_prefetch = 0 : i64, scratch_operands = 1 : i64, tpu.core_type = #tpu.core_type<tc>, window_params = [{transform_indices = @transform_0, window_bounds = array<i64: 1, 16, 16, 16>}, {pipeline_mode = #tpu.pipeline_mode<synchronous>, transform_indices = @transform_1, window_bounds = array<i64: 144, 32>}, {pipeline_mode = #tpu.pipeline_mode<synchronous>, transform_indices = @transform_2, window_bounds = array<i64: 1, 32>}, {pipeline_mode = #tpu.pipeline_mode<synchronous>, transform_indices = @transform_3, window_bounds = array<i64: 1, 32>}, {transform_indices = @transform_4, window_bounds = array<i64: 1, 8, 16, 32>}]} {
    %c8_i32 = arith.constant 8 : i32
    %0 = arith.muli %arg1, %c8_i32 : i32
    %1 = tpu.assume_multiple %0, 8 : i32
    %cst = arith.constant 0.000000e+00 : bf16
    %2 = vector.broadcast %cst : bf16 to vector<10x1x16xbf16>
    %c0 = arith.constant 0 : index
    %c0_0 = arith.constant 0 : index
    %c0_1 = arith.constant 0 : index
    %3 = vector.load %arg7[%c0, %c0_0, %c0_1] : memref<10x18x16xbf16, #tpu.memory_space<vmem>>, vector<10x1x16xbf16>
    tpu.vector_store %arg7[%c0, %c0_0, %c0_1], %2 {strides = array<i32>} : memref<10x18x16xbf16, #tpu.memory_space<vmem>>, vector<10x1x16xbf16>,
    %cst_2 = arith.constant 0.000000e+00 : bf16
    %4 = vector.broadcast %cst_2 : bf16 to vector<10x1x16xbf16>
    %c0_3 = arith.constant 0 : index
    %c17 = arith.constant 17 : index
    %c0_4 = arith.constant 0 : index
    %5 = vector.load %arg7[%c0_3, %c17, %c0_4] : memref<10x18x16xbf16, #tpu.memory_space<vmem>>, vector<10x1x16xbf16>
    tpu.vector_store %arg7[%c0_3, %c17, %c0_4], %4 {strides = array<i32>} : memref<10x18x16xbf16, #tpu.memory_space<vmem>>, vector<10x1x16xbf16>,
    %c0_i32 = arith.constant 0 : i32
    %6 = arith.cmpi eq, %arg1, %c0_i32 : i32
    %7 = arith.extui %6 : i1 to i32
    %c0_i32_5 = arith.constant 0 : i32
    %8 = arith.cmpi ne, %7, %c0_i32_5 : i32
    scf.if %8 {
      %cst_36 = arith.constant 0.000000e+00 : bf16
      %59 = vector.broadcast %cst_36 : bf16 to vector<1x18x16xbf16>
      %c0_37 = arith.constant 0 : index
      %c0_38 = arith.constant 0 : index
      %c0_39 = arith.constant 0 : index
      %60 = vector.load %arg7[%c0_37, %c0_38, %c0_39] : memref<10x18x16xbf16, #tpu.memory_space<vmem>>, vector<1x18x16xbf16>
      tpu.vector_store %arg7[%c0_37, %c0_38, %c0_39], %59 {strides = array<i32>} : memref<10x18x16xbf16, #tpu.memory_space<vmem>>, vector<1x18x16xbf16>,
    } else {
    }
    %c1_i32 = arith.constant 1 : i32
    %9 = arith.cmpi eq, %arg1, %c1_i32 : i32
    %10 = arith.extui %9 : i1 to i32
    %c0_i32_6 = arith.constant 0 : i32
    %11 = arith.cmpi ne, %10, %c0_i32_6 : i32
    scf.if %11 {
      %cst_36 = arith.constant 0.000000e+00 : bf16
      %59 = vector.broadcast %cst_36 : bf16 to vector<1x18x16xbf16>
      %c9 = arith.constant 9 : index
      %c0_37 = arith.constant 0 : index
      %c0_38 = arith.constant 0 : index
      %60 = vector.load %arg7[%c9, %c0_37, %c0_38] : memref<10x18x16xbf16, #tpu.memory_space<vmem>>, vector<1x18x16xbf16>
      tpu.vector_store %arg7[%c9, %c0_37, %c0_38], %59 {strides = array<i32>} : memref<10x18x16xbf16, #tpu.memory_space<vmem>>, vector<1x18x16xbf16>,
    } else {
    }
    %c0_7 = arith.constant 0 : index
    %12 = arith.index_cast %1 : i32 to index
    %c0_8 = arith.constant 0 : index
    %c0_9 = arith.constant 0 : index
    %13 = vector.load %arg2[%c0_7, %12, %c0_8, %c0_9] : memref<1x16x16x16xf32, #tpu.memory_space<vmem>>, vector<1x8x16x16xf32>
    %14 = vector.shape_cast %13 : vector<1x8x16x16xf32> to vector<8x16x16xf32>
    %15 = arith.truncf %14 : vector<8x16x16xf32> to vector<8x16x16xbf16>
    %c1 = arith.constant 1 : index
    %c1_10 = arith.constant 1 : index
    %c0_11 = arith.constant 0 : index
    %16 = vector.load %arg7[%c1, %c1_10, %c0_11] : memref<10x18x16xbf16, #tpu.memory_space<vmem>>, vector<8x16x16xbf16>
    tpu.vector_store %arg7[%c1, %c1_10, %c0_11], %15 {strides = array<i32>} : memref<10x18x16xbf16, #tpu.memory_space<vmem>>, vector<8x16x16xbf16>,
    %c0_i32_12 = arith.constant 0 : i32
    %17 = arith.cmpi sgt, %arg1, %c0_i32_12 : i32
    %18 = arith.extui %17 : i1 to i32
    %c0_i32_13 = arith.constant 0 : i32
    %19 = arith.cmpi ne, %18, %c0_i32_13 : i32
    scf.if %19 {
      %c1_i32_36 = arith.constant 1 : i32
      %59 = arith.subi %1, %c1_i32_36 : i32
      %c0_37 = arith.constant 0 : index
      %60 = arith.index_cast %59 : i32 to index
      %c0_38 = arith.constant 0 : index
      %c0_39 = arith.constant 0 : index
      %61 = vector.load %arg2[%c0_37, %60, %c0_38, %c0_39] : memref<1x16x16x16xf32, #tpu.memory_space<vmem>>, vector<1x1x16x16xf32>
      %62 = vector.shape_cast %61 : vector<1x1x16x16xf32> to vector<1x16x16xf32>
      %63 = arith.truncf %62 : vector<1x16x16xf32> to vector<1x16x16xbf16>
      %c0_40 = arith.constant 0 : index
      %c1_41 = arith.constant 1 : index
      %c0_42 = arith.constant 0 : index
      %64 = vector.load %arg7[%c0_40, %c1_41, %c0_42] : memref<10x18x16xbf16, #tpu.memory_space<vmem>>, vector<1x16x16xbf16>
      tpu.vector_store %arg7[%c0_40, %c1_41, %c0_42], %63 {strides = array<i32>} : memref<10x18x16xbf16, #tpu.memory_space<vmem>>, vector<1x16x16xbf16>,
    } else {
    }
    %c1_i32_14 = arith.constant 1 : i32
    %20 = arith.cmpi slt, %arg1, %c1_i32_14 : i32
    %21 = arith.extui %20 : i1 to i32
    %c0_i32_15 = arith.constant 0 : i32
    %22 = arith.cmpi ne, %21, %c0_i32_15 : i32
    scf.if %22 {
      %c8_i32_36 = arith.constant 8 : i32
      %59 = arith.addi %1, %c8_i32_36 : i32
      %c0_37 = arith.constant 0 : index
      %60 = arith.index_cast %59 : i32 to index
      %c0_38 = arith.constant 0 : index
      %c0_39 = arith.constant 0 : index
      %61 = vector.load %arg2[%c0_37, %60, %c0_38, %c0_39] : memref<1x16x16x16xf32, #tpu.memory_space<vmem>>, vector<1x1x16x16xf32>
      %62 = vector.shape_cast %61 : vector<1x1x16x16xf32> to vector<1x16x16xf32>
      %63 = arith.truncf %62 : vector<1x16x16xf32> to vector<1x16x16xbf16>
      %c9 = arith.constant 9 : index
      %c1_40 = arith.constant 1 : index
      %c0_41 = arith.constant 0 : index
      %64 = vector.load %arg7[%c9, %c1_40, %c0_41] : memref<10x18x16xbf16, #tpu.memory_space<vmem>>, vector<1x16x16xbf16>
      tpu.vector_store %arg7[%c9, %c1_40, %c0_41], %63 {strides = array<i32>} : memref<10x18x16xbf16, #tpu.memory_space<vmem>>, vector<1x16x16xbf16>,
    } else {
    }
    %c0_16 = arith.constant 0 : index
    %c0_17 = arith.constant 0 : index
    %c0_18 = arith.constant 0 : index
    %23 = vector.load %arg7[%c0_16, %c0_17, %c0_18] : memref<10x18x16xbf16, #tpu.memory_space<vmem>>, vector<10x16x16xbf16>
    %c0_19 = arith.constant 0 : index
    %c1_20 = arith.constant 1 : index
    %c0_21 = arith.constant 0 : index
    %24 = vector.load %arg7[%c0_19, %c1_20, %c0_21] : memref<10x18x16xbf16, #tpu.memory_space<vmem>>, vector<10x16x16xbf16>
    %c0_22 = arith.constant 0 : index
    %c2 = arith.constant 2 : index
    %c0_23 = arith.constant 0 : index
    %25 = vector.load %arg7[%c0_22, %c2, %c0_23] : memref<10x18x16xbf16, #tpu.memory_space<vmem>>, vector<10x16x16xbf16>
    %26 = vector.extract_strided_slice %23 {offsets = [0, 0, 0], sizes = [8, 16, 16], strides = [1, 1, 1]} : vector<10x16x16xbf16> to vector<8x16x16xbf16>
    %27 = vector.shape_cast %26 : vector<8x16x16xbf16> to vector<128x16xbf16>
    %28 = vector.extract_strided_slice %24 {offsets = [0, 0, 0], sizes = [8, 16, 16], strides = [1, 1, 1]} : vector<10x16x16xbf16> to vector<8x16x16xbf16>
    %29 = vector.shape_cast %28 : vector<8x16x16xbf16> to vector<128x16xbf16>
    %30 = vector.extract_strided_slice %25 {offsets = [0, 0, 0], sizes = [8, 16, 16], strides = [1, 1, 1]} : vector<10x16x16xbf16> to vector<8x16x16xbf16>
    %31 = vector.shape_cast %30 : vector<8x16x16xbf16> to vector<128x16xbf16>
    %32 = vector.extract_strided_slice %23 {offsets = [1, 0, 0], sizes = [8, 16, 16], strides = [1, 1, 1]} : vector<10x16x16xbf16> to vector<8x16x16xbf16>
    %33 = vector.shape_cast %32 : vector<8x16x16xbf16> to vector<128x16xbf16>
    %34 = vector.extract_strided_slice %24 {offsets = [1, 0, 0], sizes = [8, 16, 16], strides = [1, 1, 1]} : vector<10x16x16xbf16> to vector<8x16x16xbf16>
    %35 = vector.shape_cast %34 : vector<8x16x16xbf16> to vector<128x16xbf16>
    %36 = vector.extract_strided_slice %25 {offsets = [1, 0, 0], sizes = [8, 16, 16], strides = [1, 1, 1]} : vector<10x16x16xbf16> to vector<8x16x16xbf16>
    %37 = vector.shape_cast %36 : vector<8x16x16xbf16> to vector<128x16xbf16>
    %38 = vector.extract_strided_slice %23 {offsets = [2, 0, 0], sizes = [8, 16, 16], strides = [1, 1, 1]} : vector<10x16x16xbf16> to vector<8x16x16xbf16>
    %39 = vector.shape_cast %38 : vector<8x16x16xbf16> to vector<128x16xbf16>
    %40 = vector.extract_strided_slice %24 {offsets = [2, 0, 0], sizes = [8, 16, 16], strides = [1, 1, 1]} : vector<10x16x16xbf16> to vector<8x16x16xbf16>
    %41 = vector.shape_cast %40 : vector<8x16x16xbf16> to vector<128x16xbf16>
    %42 = vector.extract_strided_slice %25 {offsets = [2, 0, 0], sizes = [8, 16, 16], strides = [1, 1, 1]} : vector<10x16x16xbf16> to vector<8x16x16xbf16>
    %43 = vector.shape_cast %42 : vector<8x16x16xbf16> to vector<128x16xbf16>
    %44 = tpu.concatenate %27, %29, %31, %33, %35, %37, %39, %41, %43 in 1 : vector<128x16xbf16>, vector<128x16xbf16>, vector<128x16xbf16>, vector<128x16xbf16>, vector<128x16xbf16>, vector<128x16xbf16>, vector<128x16xbf16>, vector<128x16xbf16>, vector<128x16xbf16> -> vector<128x144xbf16>
    %c0_24 = arith.constant 0 : index
    %c0_25 = arith.constant 0 : index
    %45 = vector.load %arg3[%c0_24, %c0_25] : memref<144x32xbf16, #tpu.memory_space<vmem>>, vector<144x32xbf16>
    %cst_26 = arith.constant dense<0.000000e+00> : vector<128x32xf32>
    %46 = tpu.matmul %44, %45, %cst_26 {dimension_numbers = #tpu.dot_dimension_numbers<[1], [0], [0], [1], [0, 0, 1, 1], [], []>} : vector<128x144xbf16>, vector<144x32xbf16>, vector<128x32xf32> -> vector<128x32xf32>
    %c0_27 = arith.constant 0 : index
    %c0_28 = arith.constant 0 : index
    %47 = vector.load %arg4[%c0_27, %c0_28] : memref<1x32xf32, #tpu.memory_space<vmem>>, vector<1x32xf32>
    %48 = vector.broadcast %47 : vector<1x32xf32> to vector<128x32xf32>
    %49 = arith.mulf %46, %48 : vector<128x32xf32>
    %c0_29 = arith.constant 0 : index
    %c0_30 = arith.constant 0 : index
    %50 = vector.load %arg5[%c0_29, %c0_30] : memref<1x32xf32, #tpu.memory_space<vmem>>, vector<1x32xf32>
    %51 = vector.broadcast %50 : vector<1x32xf32> to vector<128x32xf32>
    %52 = arith.addf %49, %51 : vector<128x32xf32>
    %cst_31 = arith.constant 0.000000e+00 : f32
    %53 = vector.broadcast %cst_31 : f32 to vector<128x32xf32>
    %54 = arith.maximumf %52, %53 : vector<128x32xf32>
    %55 = vector.shape_cast %54 : vector<128x32xf32> to vector<8x16x32xf32>
    %c0_32 = arith.constant 0 : index
    %c0_33 = arith.constant 0 : index
    %c0_34 = arith.constant 0 : index
    %c0_35 = arith.constant 0 : index
    %56 = vector.load %arg6[%c0_32, %c0_33, %c0_34, %c0_35] : memref<1x8x16x32xf32, #tpu.memory_space<vmem>>, vector<1x8x16x32xf32>
    %57 = vector.shape_cast %56 : vector<1x8x16x32xf32> to vector<8x16x32xf32>
    %58 = vector.shape_cast %55 : vector<8x16x32xf32> to vector<1x8x16x32xf32>
    tpu.vector_store %arg6[%c0_32, %c0_33, %c0_34, %c0_35], %58 {strides = array<i32>} : memref<1x8x16x32xf32, #tpu.memory_space<vmem>>, vector<1x8x16x32xf32>,
    return
  }
  func.func @transform_0(%arg0: i32, %arg1: i32) -> (i32, i32, i32, i32) {
    %c0_i32 = arith.constant 0 : i32
    %c0_i32_0 = arith.constant 0 : i32
    %c0_i32_1 = arith.constant 0 : i32
    %c0_i32_2 = arith.constant 0 : i32
    return %arg0, %c0_i32, %c0_i32_0, %c0_i32_1 : i32, i32, i32, i32
  }
  func.func @transform_1(%arg0: i32, %arg1: i32) -> (i32, i32) {
    %c0_i32 = arith.constant 0 : i32
    %c0_i32_0 = arith.constant 0 : i32
    %c0_i32_1 = arith.constant 0 : i32
    return %c0_i32, %c0_i32_0 : i32, i32
  }
  func.func @transform_2(%arg0: i32, %arg1: i32) -> (i32, i32) {
    %c0_i32 = arith.constant 0 : i32
    %c0_i32_0 = arith.constant 0 : i32
    %c0_i32_1 = arith.constant 0 : i32
    return %c0_i32, %c0_i32_0 : i32, i32
  }
  func.func @transform_3(%arg0: i32, %arg1: i32) -> (i32, i32) {
    %c0_i32 = arith.constant 0 : i32
    %c0_i32_0 = arith.constant 0 : i32
    %c0_i32_1 = arith.constant 0 : i32
    return %c0_i32, %c0_i32_0 : i32, i32
  }
  func.func @transform_4(%arg0: i32, %arg1: i32) -> (i32, i32, i32, i32) {
    %c0_i32 = arith.constant 0 : i32
    %c0_i32_0 = arith.constant 0 : i32
    %c0_i32_1 = arith.constant 0 : i32
    return %arg0, %arg1, %c0_i32, %c0_i32_0 : i32, i32, i32, i32
  }
}

</mosaic_0001>

<bundles_post_ra>
// kernel: tpu_custom_call.1
= control target key start
LH: loop header
LB: loop body
LE: loop exit
PB: predicated region body
PF: predicated region fallthrough
CT: control target
= control target key end

     0   :  { %9 = vsyncpa [#allocation4], 0  ;;  %s3244_s0 = inlined_call_operand.hbm [shape: f32[2,16,16,16], index: 0, kind: input, shape index: {}]   ;;  %s3245_s1 = inlined_call_operand.vmem [shape: bf16[144,32], index: 1, kind: input, shape index: {}]   ;;  %s3246_s2 = inlined_call_operand.vmem [shape: f32[1,32], index: 2, kind: input, shape index: {}]   ;;  %s3247_s3 = inlined_call_operand.vmem [shape: f32[1,32], index: 3, kind: input, shape index: {}]   ;;  %s3248_s4 = inlined_call_operand.hbm [shape: f32[2,16,16,32], index: 4, kind: output, shape index: {}]  }
   0x1   :  { %11 = vsyncpa [#allocation4 + $0x1], 0 }
   0x2   :  { %12 = vsyncpa [#allocation5], 0 }
   0x3   :  { %14 = vsyncpa [#allocation5 + $0x1], 0  ;;  %s2286_s15 = smov 0   ;;  %s2288_s16 = smov 0  }
   0x4   :  { %s2290_s17 = smov 0   ;;  %s2292_s18 = smov 0  }
   0x5   :  { %s2294_s19 = smov 0   ;;  %s2296_s20 = smov 0  }
   0x6   :  { %s2298_s21 = smov 0   ;;  %s2300_s22 = smov 0  }
   0x7   :  { %s2302_s23 = smov 0   ;;  %s2304_s24 = smov 0  }
   0x8   :  { %s2306_s25 = smov 0  }
   0x9 LB: > { %s1806_s26 = sadd.s32 4294967295, %s2243_s25   ;;  %s1807_s27 = sadd.s32 4294967294, %s2243_s25   ;;  %s2243_s25 = sphi %s2306_s25, %s20_s25   ;;  %s2239_s24 = sphi %s2304_s24, %s3285_s24   ;;  %s2235_s23 = sphi %s2302_s23, %s3284_s23   ;;  %s2231_s22 = sphi %s2300_s22, %s3283_s22   ;;  %s2227_s21 = sphi %s2298_s21, %s3282_s21   ;;  %s2223_s20 = sphi %s2296_s20, %s3281_s20   ;;  %s2219_s19 = sphi %s2294_s19, %s3280_s19   ;;  %s2215_s18 = sphi %s2292_s18, %s3279_s18   ;;  %s2211_s17 = sphi %s2290_s17, %s3278_s17   ;;  %s2207_s16 = sphi %s2288_s16, %s3277_s16   ;;  %s2203_s15 = sphi %s2286_s15, %s3276_s15  }
   0xa   : > { %s29_s28 = sadd.s32 1, %s2235_s23  ;;  %s32_s29 = sadd.s32 1, %s2239_s24 }
   0xb   : > { %p30_p0 = scmp.ge.s32.totalorder %s29_s28, 2  ;;  %s39_s30 = sadd.s32 1, %s2223_s20 }
   0xc   : > { %p46_p1 = scmp.ne.s32.totalorder %s2223_s20, %s2219_s19  ;;  %p47_p2 = scmp.eq.s32.totalorder %s2243_s25, 0 }
   0xd   : > { %s3287_s28 = smov (%p30_p0, %s29_s28), 0  ;;  %s3289_s29 = smov (!%p30_p0, %s32_s29), %s2239_s24 }
   0xe   : > { %3252 = sst [smem:[#allocation9_spill]] %s3287_s28  ;;  %p2350_p3 = por %p47_p2, %p46_p1 }
   0xf   : > { %p52_p4 = scmp.ne.s32.totalorder %s2219_s19, %s2215_s18  ;;  %p34_p5 = scmp.ge.s32.totalorder %s3289_s29, 2 }
  0x10   : > { %p53_p6 = scmp.eq.s32.totalorder %s1806_s26, 0  ;;  %s126_s6 = ssub.s32 %s2235_s23, %s3287_s28 }
  0x11   : > { %s130_s7 = sadd.s32 1, %s2211_s17  ;;  %s3291_s29 = smov (%p34_p5, %s3289_s29), 0 }
  0x12   : > { %3254 = sst [smem:[#allocation10_spill]] %s3291_s29  ;;  %p2360_p7 = por %p53_p6, %p52_p4 }
  0x13   : > { %p140_p8 = scmp.ne.s32.totalorder %s2211_s17, %s2207_s16  ;;  %s36_s9 = ssub.s32 %s2239_s24, %s3291_s29 }
  0x14   : > { %p141_p9 = scmp.eq.s32.totalorder %s1806_s26, 3  ;;  %p37_p10 = scmp.eq.s32.totalorder %s36_s9, 0 }
  0x15   : > { %s127_s10 = sor.u32 %s126_s6, %s36_s9  ;;  %p146_p13 = scmp.ne.s32.totalorder %s2207_s16, %s2203_s15 }
  0x16   : > { %p128_p11 = scmp.eq.s32.totalorder %s127_s10, 0  ;;  %p2368_p12 = por %p141_p9, %p140_p8 }
  0x17   : > { %s2373_s12 = scalar_select %p37_p10, %s2223_s20, %s39_s30  }
  0x18   : > { %s3256_s11 = scalar_select %p2368_p12, 1, 0 }
  0x19   : > { %s2376_s13 = scalar_select %p128_p11, %s2211_s17, %s130_s7  }
  0x1a   : > { %p147_p0 = scmp.eq.s32.totalorder %s1807_s27, 3  ;;  %p1968_p1 = scmp.lt.s32.totalorder %s2243_s25, 4 }
  0x1b   : > { %s176_s18 = sand.u32 1, %s2223_s20   ;;  %s1914_s6 = sshll.u32 %s2239_s24, 12 }
  0x1c   : > { %p2381_p2 = por %p147_p0, %p146_p13  ;;  %s1810_s26 = sshll.u32 %s176_s18, 8 }
  0x1d   : > { %s2390_s29 = scalar_lea.hbm %s3244_s0, %s1914_s6  ;;  %s180_s30 = scalar_lea.vmem [#allocation3], %s1810_s26 }
  0x1e   : > { %s3257_s14 = scalar_select %p2381_p2, 1, 0 }
  0x1f   : > { %s187_s7 = sshll.u32 %s180_s30, 4  ;;  %p2396_p4 = pnand %p1968_p1, %p2350_p3  ;;  %s2392_s7 = int_to_ptr.vmem [resolvable:$true] %s187_s7 }
  0x20   : > { %s2401_s28 = scalar_lea.sflag [#allocation4], %s176_s18  ;;  %s2091_s6 = scalar_lea.hbm %s2390_s29, 4096 }
  0x21   : > { %p2092_p6 = scmp.ne.s32.totalorder %s2390_s29, %s2091_s6  ;;  %p2093_p8 = pneg %p2396_p4 }
  0x22   : > { %s2096_s5 = scalar_lea.hbm %s3244_s0, 8192  ;;  %p2097_p3 = scmp.lt.u32.totalorder %s2390_s29, %s3244_s0 }
  0x23   : > { %p2094_p9 = pnand %p2093_p8, %p2092_p6  ;;  %p2098_p11 = scmp.lt.u32.totalorder %s2096_s5, %s2091_s6 }
  0x24   : > { %p2100_p0 = scmp.lt.u32.totalorder %s2091_s6, %s2390_s29 }
  0x25   : > { %p2095_p10 = pneg %p2094_p9  ;;  %p2099_p13 = por %p2098_p11, %p2097_p3 }
  0x27   : > { %p2101_p1 = por %p2100_p0, %p2099_p13 }
  0x29   : > { %p2102_p5 = pnand %p2101_p1, %p2095_p10 }
  0x2b   : > { %2105 = shalt.err (!%p2102_p5)
}
  0x2c   : > { %s2106_s18 = scalar_lea.vmem %s2392_s7, 4096  ;;  %s2245_s26 = smov [#allocation3]  }
  0x2d   : > { %p2107_p6 = scmp.ne.s32.totalorder %s2392_s7, %s2106_s18  ;;  %s2111_s9 = sshll.u32 %s2245_s26, 4  ;;  %s2112_s9 = int_to_ptr.vmem [resolvable:$false] %s2111_s9 }
  0x2e   : > { %s2113_s10 = scalar_lea.vmem %s2112_s9, 8192  ;;  %p2114_p12 = scmp.lt.s32.totalorder %s2392_s7, %s2112_s9 }
  0x2f   : > { %p2109_p9 = pnand %p2107_p6, %p2093_p8  ;;  %p2115_p3 = scmp.lt.s32.totalorder %s2113_s10, %s2106_s18 }
  0x31   : > { %p2110_p2 = pneg %p2109_p9  ;;  %p2116_p11 = por %p2115_p3, %p2114_p12 }
  0x33   : > { %p2117_p13 = pnand %p2116_p11, %p2110_p2 }
  0x35   : > { %2120 = shalt.err (!%p2117_p13)
}
  0x36   : > { %s2246_s6 = smov 128   ;;  %s2247_s5 = smov 8  }
  0x37   : > { %1963 = dma.hbm_to_vmem [thread:$0]  (!%p2396_p4), %s2390_s29, 4096, %s2392_s7, %s2401_s28, %s2246_s6, %s2246_s6, %s2247_s5  }
  0x38   : > { %p195_p5 = scmp.lt.s32.totalorder %s2243_s25, 5  ;;  %p3259_p8 = scmp.ge.s32.totalorder %s2243_s25, 1 }
  0x3a   : > { %p196_p10 = pnand %p3259_p8, %p195_p5 }
  0x3b   : > { %s201_s30 = sand.u32 (!%p196_p10), 1, %s2219_s19  }
  0x3c   : > { %199 = sbr.rel (%p196_p10) target bundleno = 635 (0x27b), region = 36  ;;  %s2433_s18 = sshll.u32 (!%p196_p10), %s201_s30, 8 }
  0x3d   : > { %s202_s26 = scalar_lea.sflag (!%p196_p10), [#allocation4], %s201_s30  ;;  %s205_s9 = scalar_lea.vmem (!%p196_p10), [#allocation3], %s2433_s18 }
  0x43   : > { %2194 = dma.done.wait (%p2360_p7), %s202_s26, 4096  }
  0x44   : > { %2196 = vsyncadd (%p2360_p7), %s202_s26, 4294963200  ;;  %s227_s28 = sand.u32 1, %s2207_s16   ;;  %s1816_s29 = sshll.u32 %s2227_s21, 3  ;;  %vm233_vm0 = vcmask 122880   ;;  %vm234_vm1 = vsmask.f32 256 }
  0x45   : > { %s2444_s7 = sshll.u32 %s227_s28, 7  ;;  %vm2448_vm2 = vmand %vm233_vm0, %vm234_vm1  ;;  %vm266_vm3 = vsmask.f32 7938  ;;  %v236_v1 = vld [vmem:[#allocation2] sm:$0x1]  ;;  %p1817_p7 = scmp.ne.s32.totalorder %s2227_s21, 0 }
  0x46   : > { %v239_v2 = vld [vmem:[#allocation2 + $0xc] sm:$0x1]  ;;  %v242_v3 = vld [vmem:[#allocation2 + $0x18] sm:$0x1]  ;;  %v237_v4 = vsel %vm2448_vm2, 0, %v236_v1  ;;  %vm2466_vm4 = vmand %vm233_vm0, %vm266_vm3  ;;  %s2499_s8 = scalar_lea.vmem [#allocation6], %s2444_s7 }
  0x47   : > { %v240_v5 = vsel %vm2448_vm2, 0, %v239_v2  ;;  %v243_v6 = vsel %vm2448_vm2, 0, %v242_v3  ;;  %v245_v7 = vld [vmem:[#allocation2 + $0x24] sm:$0x1]  ;;  %238 = vst [vmem:[#allocation2] sm:$0x1] %v237_v4 }
  0x48   : > { %241 = vst [vmem:[#allocation2 + $0xc] sm:$0x1] %v240_v5  ;;  %244 = vst [vmem:[#allocation2 + $0x18] sm:$0x1] %v243_v6  ;;  %v246_v8 = vsel %vm2448_vm2, 0, %v245_v7  ;;  %vm302_vm5 = vcmask (!%p1817_p7), 125952  }
  0x49   : > { %v248_v9 = vld [vmem:[#allocation2 + $0x30] sm:$0x1]  ;;  %v251_v10 = vld [vmem:[#allocation2 + $0x3c] sm:$0x1]  ;;  %247 = vst [vmem:[#allocation2 + $0x24] sm:$0x1] %v246_v8 }
  0x4a   : > { %v249_v11 = vsel %vm2448_vm2, 0, %v248_v9  ;;  %v252_v12 = vsel %vm2448_vm2, 0, %v251_v10  ;;  %v254_v13 = vld [vmem:[#allocation2 + $0x48] sm:$0x1]  ;;  %v257_v14 = vld [vmem:[#allocation2 + $0x54] sm:$0x1] }
  0x4b   : > { %250 = vst [vmem:[#allocation2 + $0x30] sm:$0x1] %v249_v11  ;;  %253 = vst [vmem:[#allocation2 + $0x3c] sm:$0x1] %v252_v12  ;;  %v255_v16 = vsel %vm2448_vm2, 0, %v254_v13  ;;  %v258_v17 = vsel %vm2448_vm2, 0, %v257_v14 }
  0x4c   : > { %v260_v18 = vld [vmem:[#allocation2 + $0x60] sm:$0x1]  ;;  %v263_v19 = vld [vmem:[#allocation2 + $0x6c] sm:$0x1]  ;;  %256 = vst [vmem:[#allocation2 + $0x48] sm:$0x1] %v255_v16 }
  0x4d   : > { %259 = vst [vmem:[#allocation2 + $0x54] sm:$0x1] %v258_v17  ;;  %v261_v20 = vsel %vm2448_vm2, 0, %v260_v18  ;;  %v264_v21 = vsel %vm2448_vm2, 0, %v263_v19  ;;  %v268_v22 = vld [vmem:[#allocation2 + $0x8] sm:$0x1] }
  0x4e   : > { %v271_v23 = vld [vmem:[#allocation2 + $0x14] sm:$0x1]  ;;  %262 = vst [vmem:[#allocation2 + $0x60] sm:$0x1] %v261_v20  ;;  %265 = vst [vmem:[#allocation2 + $0x6c] sm:$0x1] %v264_v21 }
  0x4f   : > { %v269_v24 = vsel %vm2466_vm4, 0, %v268_v22  ;;  %v272_v25 = vsel %vm2466_vm4, 0, %v271_v23  ;;  %v274_v26 = vld [vmem:[#allocation2 + $0x20] sm:$0x1]  ;;  %v277_v27 = vld [vmem:[#allocation2 + $0x2c] sm:$0x1] }
  0x50   : > { %270 = vst [vmem:[#allocation2 + $0x8] sm:$0x1] %v269_v24  ;;  %273 = vst [vmem:[#allocation2 + $0x14] sm:$0x1] %v272_v25  ;;  %v275_v28 = vsel %vm2466_vm4, 0, %v274_v26  ;;  %v278_v29 = vsel %vm2466_vm4, 0, %v277_v27 }
  0x51   : > { %v280_v30 = vld [vmem:[#allocation2 + $0x38] sm:$0x1]  ;;  %v283_v31 = vld [vmem:[#allocation2 + $0x44] sm:$0x1]  ;;  %276 = vst [vmem:[#allocation2 + $0x20] sm:$0x1] %v275_v28 }
  0x52   : > { %279 = vst [vmem:[#allocation2 + $0x2c] sm:$0x1] %v278_v29  ;;  %v281_v32 = vsel %vm2466_vm4, 0, %v280_v30  ;;  %v284_v33 = vsel %vm2466_vm4, 0, %v283_v31  ;;  %v286_v34 = vld [vmem:[#allocation2 + $0x50] sm:$0x1] }
  0x53   : > { %v289_v35 = vld [vmem:[#allocation2 + $0x5c] sm:$0x1]  ;;  %282 = vst [vmem:[#allocation2 + $0x38] sm:$0x1] %v281_v32  ;;  %285 = vst [vmem:[#allocation2 + $0x44] sm:$0x1] %v284_v33 }
  0x54   : > { %v287_v36 = vsel %vm2466_vm4, 0, %v286_v34  ;;  %v290_v37 = vsel %vm2466_vm4, 0, %v289_v35  ;;  %v292_v38 = vld [vmem:[#allocation2 + $0x68] sm:$0x1]  ;;  %v295_v39 = vld [vmem:[#allocation2 + $0x74] sm:$0x1] }
  0x55   : > { %288 = vst [vmem:[#allocation2 + $0x50] sm:$0x1] %v287_v36  ;;  %291 = vst [vmem:[#allocation2 + $0x5c] sm:$0x1] %v290_v37  ;;  %v293_v40 = vsel %vm2466_vm4, 0, %v292_v38  ;;  %v296_v41 = vsel %vm2466_vm4, 0, %v295_v39 }
  0x56   : > { %294 = vst [vmem:[#allocation2 + $0x68] sm:$0x1] %v293_v40  ;;  %297 = vst [vmem:[#allocation2 + $0x74] sm:$0x1] %v296_v41  ;;  %301 = sbr.rel (%p1817_p7) target bundleno = 93 (0x5d), region = 44  ;;  %v2248_v42 = vmov (!%p1817_p7), 0  }
  0x57   : > { %303 = vst.msk [vmem:[#allocation2] sm:$0xf] (!%p1817_p7), %vm302_vm5, %v2248_v42  ;;  %304 = vst.msk [vmem:[#allocation2 + $0x4] sm:$0xf] (!%p1817_p7), %vm302_vm5, %v2248_v42 }
  0x58   : > { %306 = vst.msk [vmem:[#allocation2 + $0x8] sm:$0x1] (!%p1817_p7), %vm233_vm0, %v2248_v42 }
  0x5d PF: > { %p1818_p12 = scmp.ne.s32.totalorder %s2227_s21, 1 }
  0x5e   : > { %vm312_vm6 = vcmask (!%p1818_p12), 125952   ;;  %v2249_v43 = vmov (!%p1818_p12), 0  }
  0x5f   : > { %310 = sbr.rel (%p1818_p12) target bundleno = 102 (0x66), region = 48  ;;  %313 = vst.msk [vmem:[#allocation2 + $0x6c] sm:$0xf] (!%p1818_p12), %vm312_vm6, %v2249_v43  ;;  %314 = vst.msk [vmem:[#allocation2 + $0x70] sm:$0xf] (!%p1818_p12), %vm312_vm6, %v2249_v43 }
  0x60   : > { %316 = vst.msk [vmem:[#allocation2 + $0x74] sm:$0x1] (!%p1818_p12), %vm233_vm0, %v2249_v43 }
  0x66 PF: > { %s1915_s27 = sshll.u32 %s2227_s21, 7  ;;  %vm546_vm7 = vcmask 125952   ;;  %vm383_vm8 = vsmask.f32 4368  ;;  %v548_v6 = vld [vmem:[#allocation2 + $0xc] sm:$0xf] }
  0x67   : > { %s2508_s10 = scalar_lea.vmem %s205_s9, %s1915_s27 [#allocation3]  ;;  %vm2520_vm9 = vmand %vm546_vm7, %vm266_vm3  ;;  %v553_v8 = vld [vmem:[#allocation2 + $0x14] sm:$0x1]  ;;  %v556_v17 = vld [vmem:[#allocation2 + $0x18] sm:$0xf]  ;;  %p1836_p2 = scmp.le.s32.totalorder %s2227_s21, 0 }
  0x68   : > { %v319_v44 = vld [vmem:[%s2508_s10] sm:$0xff]  ;;  %v320_v45 = vld [vmem:[%s2508_s10 + $0x8] sm:$0xff]  ;;  %v321_v48 = vld [vmem:[%s2508_s10 + $0x10] sm:$0xff]  ;;  %s1837_s6 = sadd.s32 (!%p1836_p2), 4294967295, %s1816_s29 }
  0x69   : > { %v1916_v46 = vpack.c.bf16 %v319_v44, %v319_v44  ;;  %v1917_v47 = vpack.c.bf16 %v320_v45, %v320_v45  ;;  %v322_v49 = vld [vmem:[%s2508_s10 + $0x18] sm:$0xff]  ;;  %v1918_v50 = vpack.c.bf16 %v321_v48, %v321_v48  ;;  %v323_v52 = vld [vmem:[%s2508_s10 + $0x20] sm:$0xff]  ;;  %v324_v53 = vld [vmem:[%s2508_s10 + $0x28] sm:$0xff]  ;;  %s1838_s5 = sshll.u32 (!%p1836_p2), %s1837_s6, 4 }
  0x6a   : > { %v1919_v51 = vpack.c.bf16 %v322_v49, %v322_v49  ;;  %v325_v62 = vld [vmem:[%s2508_s10 + $0x30] sm:$0xff]  ;;  %v326_v63 = vld [vmem:[%s2508_s10 + $0x38] sm:$0xff]  ;;  %v1920_v4 = vpack.c.bf16 %v323_v52, %v323_v52  ;;  %v1921_v5 = vpack.c.bf16 %v324_v53, %v324_v53  ;;  %vm2526_vm10 = vmor %vm234_vm1, %vm383_vm8  ;;  %s611_s30 = scalar_lea.vmem (!%p1836_p2), %s205_s9, %s1838_s5 [#allocation3] }
  0x6b   : > { %v386_v54 = vshrl.u32 %v1916_v46, 16  ;;  %v389_v55 = vshll.u32 %v1916_v46, 16  ;;  %v394_v56 = vshrl.u32 %v1917_v47, 16  ;;  %v397_v57 = vshll.u32 %v1917_v47, 16  ;;  %v560_v18 = vld [vmem:[#allocation2 + $0x20] sm:$0x1] }
  0x6c   : > { %v403_v58 = vshrl.u32 %v1918_v50, 16  ;;  %v406_v59 = vshll.u32 %v1918_v50, 16  ;;  %v411_v60 = vshrl.u32 %v1919_v51, 16  ;;  %v414_v61 = vshll.u32 %v1919_v51, 16  ;;  %v327_v27 = vld [vmem:[%s2508_s10 + $0x40] sm:$0xff]  ;;  %v328_v36 = vld [vmem:[%s2508_s10 + $0x48] sm:$0xff] }
  0x6d   : > { %v388_v1 = vrot.slane %v386_v54, 7  ;;  %v396_v3 = vrot.slane %v394_v56, 7  ;;  %v1922_v11 = vpack.c.bf16 %v325_v62, %v325_v62  ;;  %v1923_v12 = vpack.c.bf16 %v326_v63, %v326_v63  ;;  %v563_v37 = vld [vmem:[#allocation2 + $0x24] sm:$0xf]  ;;  %v567_v45 = vld [vmem:[#allocation2 + $0x2c] sm:$0x1] }
  0x6e   : > { %v405_v9 = vrot.slane %v403_v58, 7  ;;  %v413_v10 = vrot.slane %v411_v60, 7  ;;  %v420_v26 = vshrl.u32 %v1920_v4, 16  ;;  %v423_v31 = vshll.u32 %v1920_v4, 16  ;;  %v570_v47 = vld [vmem:[#allocation2 + $0x30] sm:$0xf] }
  0x6f   : > { %v391_v13 = vor.u32 %v389_v55, %v388_v1  ;;  %v392_v14 = vrot.slane %v388_v1, 4  ;;  %v399_v15 = vor.u32 %v397_v57, %v396_v3  ;;  %v401_v16 = vrot.slane %v396_v3, 4  ;;  %v574_v56 = vld [vmem:[#allocation2 + $0x38] sm:$0x1]  ;;  %v577_v57 = vld [vmem:[#allocation2 + $0x3c] sm:$0xf] }
  0x70   : > { %v408_v19 = vor.u32 %v406_v59, %v405_v9  ;;  %v409_v20 = vrot.slane %v405_v9, 4  ;;  %v416_v21 = vor.u32 %v414_v61, %v413_v10  ;;  %v418_v22 = vrot.slane %v413_v10, 4  ;;  %v329_v62 = vld [vmem:[%s2508_s10 + $0x50] sm:$0xff]  ;;  %v330_v63 = vld [vmem:[%s2508_s10 + $0x58] sm:$0xff] }
  0x71   : > { %v549_v23 = vsel %vm2520_vm9, %v391_v13, %v548_v6  ;;  %v400_v24 = vsel %vm2526_vm10, %v392_v14, %v399_v15  ;;  %v554_v25 = vsel %vm2448_vm2, %v401_v16, %v553_v8  ;;  %v422_v32 = vrot.slane %v420_v26, 7  ;;  %v331_v6 = vld [vmem:[%s2508_s10 + $0x60] sm:$0xff]  ;;  %v332_v8 = vld [vmem:[%s2508_s10 + $0x68] sm:$0xff]  ;;  %v333_v9 = vld [vmem:[%s2508_s10 + $0x70] sm:$0xff] }
  0x72   : > { %550 = vst [vmem:[#allocation2 + $0xc] sm:$0xf] %v549_v23  ;;  %552 = vst.msk [vmem:[#allocation2 + $0x10] sm:$0xf] %vm546_vm7, %v400_v24  ;;  %v557_v28 = vsel %vm2520_vm9, %v408_v19, %v556_v17  ;;  %v417_v29 = vsel %vm2526_vm10, %v409_v20, %v416_v21  ;;  %v561_v30 = vsel %vm2448_vm2, %v418_v22, %v560_v18  ;;  %v428_v33 = vshrl.u32 %v1921_v5, 16 }
  0x73   : > { %555 = vst [vmem:[#allocation2 + $0x14] sm:$0x1] %v554_v25  ;;  %558 = vst [vmem:[#allocation2 + $0x18] sm:$0xf] %v557_v28  ;;  %v431_v34 = vshll.u32 %v1921_v5, 16  ;;  %v437_v35 = vshrl.u32 %v1922_v11, 16  ;;  %v1924_v41 = vpack.c.bf16 %v327_v27, %v327_v27  ;;  %v425_v42 = vor.u32 %v423_v31, %v422_v32 }
  0x74   : > { %559 = vst.msk [vmem:[#allocation2 + $0x1c] sm:$0xf] %vm546_vm7, %v417_v29  ;;  %562 = vst [vmem:[#allocation2 + $0x20] sm:$0x1] %v561_v30  ;;  %v440_v38 = vshll.u32 %v1922_v11, 16  ;;  %v445_v39 = vshrl.u32 %v1923_v12, 16  ;;  %v1925_v51 = vpack.c.bf16 %v328_v36, %v328_v36  ;;  %v1926_v16 = vpack.c.bf16 %v329_v62, %v329_v62 }
  0x75   : > { %v448_v40 = vshll.u32 %v1923_v12, 16  ;;  %v426_v43 = vrot.slane %v422_v32, 4  ;;  %v430_v44 = vrot.slane %v428_v33, 7  ;;  %v439_v46 = vrot.slane %v437_v35, 7  ;;  %v581_v19 = vld [vmem:[#allocation2 + $0x44] sm:$0x1] }
  0x76   : > { %v447_v48 = vrot.slane %v445_v39, 7  ;;  %v454_v49 = vshrl.u32 %v1924_v41, 16  ;;  %v457_v50 = vshll.u32 %v1924_v41, 16  ;;  %v564_v52 = vsel %vm2520_vm9, %v425_v42, %v563_v37  ;;  %v588_v37 = vld [vmem:[#allocation2 + $0x50] sm:$0x1] }
  0x77   : > { %v433_v53 = vor.u32 %v431_v34, %v430_v44  ;;  %v435_v54 = vrot.slane %v430_v44, 4  ;;  %v442_v55 = vor.u32 %v440_v38, %v439_v46  ;;  %565 = vst [vmem:[#allocation2 + $0x24] sm:$0xf] %v564_v52  ;;  %v443_v58 = vrot.slane %v439_v46, 4  ;;  %v584_v34 = vld [vmem:[#allocation2 + $0x48] sm:$0xf] }
  0x78   : > { %v450_v59 = vor.u32 %v448_v40, %v447_v48  ;;  %v452_v60 = vrot.slane %v447_v48, 4  ;;  %v456_v61 = vrot.slane %v454_v49, 7  ;;  %v462_v5 = vshrl.u32 %v1925_v51, 16  ;;  %v334_v46 = vld [vmem:[%s2508_s10 + $0x78] sm:$0xff] }
  0x79   : > { %v434_v1 = vsel %vm2526_vm10, %v426_v43, %v433_v53  ;;  %v568_v3 = vsel %vm2448_vm2, %v435_v54, %v567_v45  ;;  %v571_v4 = vsel %vm2520_vm9, %v442_v55, %v570_v47  ;;  %v465_v15 = vshll.u32 %v1925_v51, 16  ;;  %v591_v43 = vld [vmem:[#allocation2 + $0x54] sm:$0xf]  ;;  %v595_v51 = vld [vmem:[#allocation2 + $0x5c] sm:$0x1] }
  0x7a   : > { %566 = vst.msk [vmem:[#allocation2 + $0x28] sm:$0xf] %vm546_vm7, %v434_v1  ;;  %569 = vst [vmem:[#allocation2 + $0x2c] sm:$0x1] %v568_v3  ;;  %v451_v10 = vsel %vm2526_vm10, %v443_v58, %v450_v59  ;;  %v575_v11 = vsel %vm2448_vm2, %v452_v60, %v574_v56  ;;  %v459_v12 = vor.u32 %v457_v50, %v456_v61  ;;  %v460_v13 = vrot.slane %v456_v61, 4 }
  0x7b   : > { %572 = vst [vmem:[#allocation2 + $0x30] sm:$0xf] %v571_v4  ;;  %573 = vst.msk [vmem:[#allocation2 + $0x34] sm:$0xf] %vm546_vm7, %v451_v10  ;;  %v464_v14 = vrot.slane %v462_v5, 7  ;;  %v1927_v17 = vpack.c.bf16 %v330_v63, %v330_v63  ;;  %v1928_v20 = vpack.c.bf16 %v331_v6, %v331_v6  ;;  %v1929_v21 = vpack.c.bf16 %v332_v8, %v332_v8 }
  0x7c   : > { %576 = vst [vmem:[#allocation2 + $0x38] sm:$0x1] %v575_v11  ;;  %v578_v18 = vsel %vm2520_vm9, %v459_v12, %v577_v57  ;;  %v1930_v22 = vpack.c.bf16 %v333_v9, %v333_v9  ;;  %v471_v25 = vshrl.u32 %v1926_v16, 16  ;;  %v474_v26 = vshll.u32 %v1926_v16, 16  ;;  %v598_v59 = vld [vmem:[#allocation2 + $0x60] sm:$0xf] }
  0x7d   : > { %579 = vst [vmem:[#allocation2 + $0x3c] sm:$0xf] %v578_v18  ;;  %v467_v23 = vor.u32 %v465_v15, %v464_v14  ;;  %v469_v24 = vrot.slane %v464_v14, 4  ;;  %v479_v27 = vshrl.u32 %v1927_v17, 16  ;;  %v482_v28 = vshll.u32 %v1927_v17, 16  ;;  %v613_v14 = vld [vmem:[%s611_s30 + $0x8] sm:$0xff] (!%p1836_p2) }
  0x7e   : > { %v488_v29 = vshrl.u32 %v1928_v20, 16  ;;  %v491_v30 = vshll.u32 %v1928_v20, 16  ;;  %v473_v33 = vrot.slane %v471_v25, 7  ;;  %v496_v35 = vshrl.u32 %v1929_v21, 16  ;;  %v602_v8 = vld [vmem:[#allocation2 + $0x68] sm:$0x1] }
  0x7f   : > { %v468_v31 = vsel %vm2526_vm10, %v460_v13, %v467_v23  ;;  %v582_v32 = vsel %vm2448_vm2, %v469_v24, %v581_v19  ;;  %v481_v36 = vrot.slane %v479_v27, 7  ;;  %v499_v39 = vshll.u32 %v1929_v21, 16  ;;  %v612_v13 = vld [vmem:[%s611_s30] sm:$0xff] (!%p1836_p2)  ;;  %v644_v24 = vld [vmem:[#allocation2 + $0x8] sm:$0x1] (!%p1836_p2) }
  0x80   : > { %580 = vst.msk [vmem:[#allocation2 + $0x40] sm:$0xf] %vm546_vm7, %v468_v31  ;;  %583 = vst [vmem:[#allocation2 + $0x44] sm:$0x1] %v582_v32  ;;  %v490_v38 = vrot.slane %v488_v29, 7  ;;  %v505_v40 = vshrl.u32 %v1930_v22, 16  ;;  %v476_v41 = vor.u32 %v474_v26, %v473_v33  ;;  %v1931_v60 = vpack.c.bf16 %v334_v46, %v334_v46 }
  0x81   : > { %v477_v42 = vrot.slane %v473_v33, 4  ;;  %v498_v44 = vrot.slane %v496_v35, 7  ;;  %v508_v45 = vshll.u32 %v1930_v22, 16  ;;  %v484_v47 = vor.u32 %v482_v28, %v481_v36  ;;  %v640_v23 = vld [vmem:[#allocation2] sm:$0xf] (!%p1836_p2) }
  0x82   : > { %v486_v48 = vrot.slane %v481_v36, 4  ;;  %v493_v49 = vor.u32 %v491_v30, %v490_v38  ;;  %v494_v50 = vrot.slane %v490_v38, 4  ;;  %v585_v52 = vsel %vm2520_vm9, %v476_v41, %v584_v34 }
  0x83   : > { %v501_v53 = vor.u32 %v499_v39, %v498_v44  ;;  %v503_v54 = vrot.slane %v498_v44, 4  ;;  %v507_v55 = vrot.slane %v505_v40, 7  ;;  %586 = vst [vmem:[#allocation2 + $0x48] sm:$0xf] %v585_v52  ;;  %v485_v56 = vsel %vm2526_vm10, %v477_v42, %v484_v47 }
  0x84   : > { %v589_v57 = vsel %vm2448_vm2, %v486_v48, %v588_v37  ;;  %v592_v58 = vsel %vm2520_vm9, %v493_v49, %v591_v43  ;;  %587 = vst.msk [vmem:[#allocation2 + $0x4c] sm:$0xf] %vm546_vm7, %v485_v56  ;;  %v513_v1 = vshrl.u32 %v1931_v60, 16  ;;  %v516_v3 = vshll.u32 %v1931_v60, 16 }
  0x85   : > { %590 = vst [vmem:[#allocation2 + $0x50] sm:$0x1] %v589_v57  ;;  %593 = vst [vmem:[#allocation2 + $0x54] sm:$0xf] %v592_v58  ;;  %v502_v61 = vsel %vm2526_vm10, %v494_v50, %v501_v53  ;;  %v596_v62 = vsel %vm2448_vm2, %v503_v54, %v595_v51  ;;  %v510_v63 = vor.u32 %v508_v45, %v507_v55  ;;  %v511_v5 = vrot.slane %v507_v55, 4  ;;  %608 = sbr.rel (%p1836_p2) target bundleno = 145 (0x91), region = 52 }
  0x86   : > { %594 = vst.msk [vmem:[#allocation2 + $0x58] sm:$0xf] %vm546_vm7, %v502_v61  ;;  %597 = vst [vmem:[#allocation2 + $0x5c] sm:$0x1] %v596_v62  ;;  %v515_v6 = vrot.slane %v513_v1, 7  ;;  %v1932_v15 = vpack.c.bf16 (!%p1836_p2), %v612_v13, %v612_v13  ;;  %v1933_v16 = vpack.c.bf16 (!%p1836_p2), %v613_v14, %v613_v14 }
  0x87   : > { %v599_v4 = vsel %vm2520_vm9, %v510_v63, %v598_v59 }
  0x88   : > { %600 = vst [vmem:[#allocation2 + $0x60] sm:$0xf] %v599_v4  ;;  %v518_v9 = vor.u32 %v516_v3, %v515_v6  ;;  %v520_v10 = vrot.slane %v515_v6, 4  ;;  %v621_v17 = vshrl.u32 (!%p1836_p2), %v1932_v15, 16  ;;  %v624_v18 = vshll.u32 (!%p1836_p2), %v1932_v15, 16 }
  0x89   : > { %v629_v19 = vshrl.u32 (!%p1836_p2), %v1933_v16, 16  ;;  %v632_v20 = vshll.u32 (!%p1836_p2), %v1933_v16, 16 }
  0x8a   : > { %v519_v11 = vsel %vm2526_vm10, %v511_v5, %v518_v9  ;;  %v603_v12 = vsel %vm2448_vm2, %v520_v10, %v602_v8  ;;  %v623_v21 = vrot.slane (!%p1836_p2), %v621_v17, 7 }
  0x8b   : > { %601 = vst.msk [vmem:[#allocation2 + $0x64] sm:$0xf] %vm546_vm7, %v519_v11  ;;  %604 = vst [vmem:[#allocation2 + $0x68] sm:$0x1] %v603_v12  ;;  %v631_v22 = vrot.slane (!%p1836_p2), %v629_v19, 7 }
  0x8c   : > { %v626_v25 = vor.u32 %v624_v18, %v623_v21  ;;  %v627_v26 = vrot.slane %v623_v21, 4 }
  0x8d   : > { %v634_v27 = vor.u32 %v632_v20, %v631_v22  ;;  %v636_v28 = vrot.slane %v631_v22, 4 }
  0x8e   : > { %v641_v29 = vsel %vm2520_vm9, %v626_v25, %v640_v23 }
  0x8f   : > { %v635_v30 = vsel %vm2526_vm10, %v627_v26, %v634_v27  ;;  %v645_v31 = vsel %vm2448_vm2, %v636_v28, %v644_v24  ;;  %642 = vst [vmem:[#allocation2] sm:$0xf] %v641_v29 }
  0x90   : > { %643 = vst.msk [vmem:[#allocation2 + $0x4] sm:$0xf] %vm546_vm7, %v635_v30  ;;  %646 = vst [vmem:[#allocation2 + $0x8] sm:$0x1] %v645_v31 }
  0x91 PF: > { %p1841_p4 = scmp.ge.s32.totalorder %s2227_s21, 1 }
  0x92   : > { %v1844_v32 = vld [vmem:[%s2508_s10 + $0x80] sm:$0xff] (!%p1841_p4)  ;;  %v1845_v33 = vld [vmem:[%s2508_s10 + $0x88] sm:$0xff] (!%p1841_p4)  ;;  %v687_v43 = vld [vmem:[#allocation2 + $0x74] sm:$0x1] (!%p1841_p4) }
  0x93   : > { %650 = sbr.rel (%p1841_p4) target bundleno = 158 (0x9e), region = 56  ;;  %v1935_v34 = vpack.c.bf16 (!%p1841_p4), %v1844_v32, %v1844_v32  ;;  %v1936_v35 = vpack.c.bf16 (!%p1841_p4), %v1845_v33, %v1845_v33  ;;  %v683_v42 = vld [vmem:[#allocation2 + $0x6c] sm:$0xf] (!%p1841_p4) }
  0x95   : > { %v663_v36 = vshrl.u32 (!%p1841_p4), %v1935_v34, 16  ;;  %v666_v37 = vshll.u32 (!%p1841_p4), %v1935_v34, 16  ;;  %v671_v38 = vshrl.u32 (!%p1841_p4), %v1936_v35, 16  ;;  %v674_v39 = vshll.u32 (!%p1841_p4), %v1936_v35, 16 }
  0x97   : > { %v665_v40 = vrot.slane (!%p1841_p4), %v663_v36, 7  ;;  %v673_v41 = vrot.slane (!%p1841_p4), %v671_v38, 7 }
  0x99   : > { %v668_v44 = vor.u32 (!%p1841_p4), %v666_v37, %v665_v40  ;;  %v669_v45 = vrot.slane (!%p1841_p4), %v665_v40, 4  ;;  %v676_v46 = vor.u32 (!%p1841_p4), %v674_v39, %v673_v41  ;;  %v678_v47 = vrot.slane (!%p1841_p4), %v673_v41, 4 }
  0x9b   : > { %v684_v48 = vsel %vm2520_vm9, %v668_v44, %v683_v42  ;;  %v677_v49 = vsel %vm2526_vm10, %v669_v45, %v676_v46  ;;  %v688_v50 = vsel %vm2448_vm2, %v678_v47, %v687_v43 }
  0x9c   : > { %685 = vst [vmem:[#allocation2 + $0x6c] sm:$0xf] %v684_v48  ;;  %686 = vst.msk [vmem:[#allocation2 + $0x70] sm:$0xf] %vm546_vm7, %v677_v49 }
  0x9d   : > { %689 = vst [vmem:[#allocation2 + $0x74] sm:$0x1] %v688_v50 }
  0x9e PF: > { %v700_v51 = vld [vmem:[#allocation2 + $0x3c] sm:$0xf]  ;;  %v2616_v52 = vld [vmem:[#allocation2 + $0x40] sm:$0xf]  ;;  %vm949_vm11 = vcmask 1042432   ;;  %s2250_s18 = smov 48  }
  0x9f   : > { %v867_v53 = vshrl.u32 %v2616_v52, 16  ;;  %v2620_v2 = vcombine.low %v700_v51, %v2616_v52  ;;  %v854_v54 = vshrl.u32 %v700_v51, 16  ;;  %v857_v7 = vshll.u32 %v700_v51, 16  ;;  %v692_v55 = vld [vmem:[#allocation2 + $0xc] sm:$0xf]  ;;  %s2251_s26 = smov 32  }
  0xa0   : > { %v2622_v56 = vld [vmem:[#allocation2 + $0x10] sm:$0xf]  ;;  %v758_v0 = vshrl.u32 %v692_v55, 16  ;;  %v761_v57 = vshll.u32 %v692_v55, 16  ;;  %v2624_v58 = vld [vmem:[#allocation2 + $0x4] sm:$0xf] }
  0xa1   : > { %1200 = vrot.lane.b32.xlu1 %v2620_v2, %s2250_s18  ;;  %v856_v59 = vrot.slane %v854_v54, 4  ;;  %v859_v60 = vrot.slane %v857_v7, 5  ;;  %v767_v61 = vshll.u32 %v2622_v56, 16  ;;  %v771_v62 = vshrl.u32 %v2622_v56, 16  ;;  %v710_v63 = vld [vmem:[#allocation2 + $0x8] sm:$0x1] }
  0xa2   : > { %v2631_v1 = vcombine.low %v692_v55, %v2622_v56  ;;  %v760_v3 = vrot.slane %v758_v0, 4  ;;  %v763_v4 = vrot.slane %v761_v57, 5  ;;  %v720_v5 = vld [vmem:[#allocation2] sm:$0xe]  ;;  %vm950_vm12 = vcmask 1046532   ;;  %s2252_s9 = smov 16  }
  0xa3   : > { %v2633_v6 = vrot.slane %v771_v62, 4  ;;  %vm2636_vm13 = vmor %vm949_vm11, %vm950_vm12  ;;  %v1848_v9 = vrot.slane %v720_v5, 9  ;;  %v954_v10 = vrot.slane %v2624_v58, 5  ;;  %v957_v11 = vrot.slane %v710_v63, 5  ;;  %v2641_v12 = vld [vmem:[#allocation2 + $0x34] sm:$0xf] }
  0xa4   : > { %1192 = vrot.lane.b32.xlu0 %v2631_v1, %s2250_s18  ;;  %v764_v13 = vor.u32 %v763_v4, %v760_v3  ;;  %v2645_v14 = vld [vmem:[#allocation2 + $0x38] sm:$0x1]  ;;  %v724_v15 = vld [vmem:[#allocation2 + $0x30] sm:$0xe]  ;;  %v982_v16 = vrot.slane %v2641_v12, 5  ;;  %v743_v17 = vshll.u32 %v2624_v58, 16  ;;  %v860_v18 = vor.u32 %v859_v60, %v856_v59 }
  0xa5   : > { %v955_v19 = vsel %vm2636_vm13, %v1848_v9, %v954_v10  ;;  %v956_v20 = vrot.slane %v954_v10, 4  ;;  %v1852_v21 = vrot.slane %v724_v15, 9  ;;  %v985_v22 = vrot.slane %v2645_v14, 5  ;;  %v2652_v23 = vld [vmem:[#allocation2] sm:$0xf]  ;;  %s2253_s29 = smov 64  }
  0xa6   : > { %v2654_v24 = vrot.slane %v764_v13, 4  ;;  %v984_v25 = vrot.slane %v982_v16, 4  ;;  %vm730_vm14 = vsmask.f32 3328  ;;  %vm731_vm15 = vsmask.f32 7440 }
  0xa7   : > { %v958_v26 = vsel %vm2636_vm13, %v956_v20, %v957_v11  ;;  %v983_v27 = vsel %vm2636_vm13, %v1852_v21, %v982_v16  ;;  %v734_v28 = vshrl.u32 %v2652_v23, 16  ;;  %v737_v29 = vshll.u32 %v2652_v23, 16  ;;  %v2665_v34 = vld [vmem:[#allocation2 + $0x44] sm:$0x1]  ;;  %v2667_v35 = vld [vmem:[#allocation2 + $0x30] sm:$0xf]  ;;  %vm2677_vm0 = vmor %vm730_vm14, %vm731_vm15 }
  0xa8   : > { %v1874_v30 = vcombine.low %v955_v19, %v958_v26  ;;  %v986_v31 = vsel %vm2636_vm13, %v984_v25, %v985_v22  ;;  %v745_v32 = vrot.slane %v743_v17, 5  ;;  %v747_v33 = vshrl.u32 %v2624_v58, 16  ;;  %v725_v57 = vld [vmem:[#allocation2 + $0x3c] sm:$0xe]  ;;  %v711_v20 = vld [vmem:[#allocation2 + $0x14] sm:$0x1] }
  0xa9   : > { %v2669_v36 = vcombine.low %v983_v27, %v986_v31  ;;  %v736_v37 = vrot.slane %v734_v28, 4  ;;  %v739_v38 = vrot.slane %v737_v29, 5  ;;  %v753_v39 = vshll.u32 %v710_v63, 16  ;;  %v702_v26 = vld [vmem:[#allocation2 + $0x48] sm:$0xf]  ;;  %s2254_s7 = smov 80  }
  0xaa   : > { %1172 = vrot.lane.b32.xlu1 %v1874_v30, %s2251_s26  ;;  %v749_v40 = vrot.slane %v747_v33, 4  ;;  %v861_v41 = vrot.slane %v860_v18, 4  ;;  %v863_v42 = vshll.u32 %v2616_v52, 16  ;;  %v869_v43 = vrot.slane %v867_v53, 4  ;;  %v2710_v33 = vld [vmem:[#allocation2 + $0x4c] sm:$0xf] }
  0xab   : > { %v740_v44 = vor.u32 %v739_v38, %v736_v37  ;;  %v755_v45 = vrot.slane %v753_v39, 5  ;;  %v873_v46 = vshll.u32 %v2665_v34, 16  ;;  %v830_v47 = vshrl.u32 %v2667_v35, 16  ;;  %s2255_s27 = smov 96   ;;  %s2256_s10 = smov 112  }
  0xac   : > { %v750_v49 = vor.u32 %v749_v40, %v745_v32  ;;  %v865_v50 = vrot.slane %v863_v42, 5  ;;  %v833_v51 = vshll.u32 %v2667_v35, 16  ;;  %v839_v54 = vshll.u32 %v2641_v12, 16  ;;  %v721_v40 = vld [vmem:[#allocation2 + $0xc] sm:$0xe]  ;;  %p3272_p1 = scmp.ne.s32.totalorder %s3256_s11, 0 }
  0xad   : > { %v741_v7 = vrot.slane %v740_v44, 4  ;;  %v875_v53 = vrot.slane %v873_v46, 5  ;;  %v832_v55 = vrot.slane %v830_v47, 4  ;;  %v843_v0 = vshrl.u32 %v2641_v12, 16 }
  0xae   : > { %1180 = vrot.lane.b32.xlu1 %v2669_v36, %s2251_s26  ;;  %v751_v59 = vrot.slane %v750_v49, 4  ;;  %v866_v60 = vsel %vm2677_vm0, %v861_v41, %v865_v50  ;;  %v870_v62 = vor.u32 %v869_v43, %v865_v50  ;;  %v835_v63 = vrot.slane %v833_v51, 5  ;;  %v2722_v43 = vld [vmem:[#allocation2 + $0x50] sm:$0x1]  ;;  %v694_v49 = vld [vmem:[#allocation2 + $0x18] sm:$0xf] }
  0xaf   : > { %v746_v3 = vsel %vm2677_vm0, %v741_v7, %v745_v32  ;;  %v841_v4 = vrot.slane %v839_v54, 5  ;;  %v845_v5 = vrot.slane %v843_v0, 4  ;;  %v849_v9 = vshll.u32 %v2645_v14, 16 }
  0xb0   : > { %v756_v10 = vsel %vm2677_vm0, %v751_v59, %v755_v45  ;;  %v871_v11 = vrot.slane %v870_v62, 4  ;;  %v836_v13 = vor.u32 %v835_v63, %v832_v55  ;;  %v1853_v15 = vrot.slane %v725_v57, 9 }
  0xb1   : > { %v1866_v16 = vcombine.low %v746_v3, %v756_v10  ;;  %v846_v17 = vor.u32 %v845_v5, %v841_v4  ;;  %v851_v18 = vrot.slane %v849_v9, 5  ;;  %v989_v19 = vrot.slane %v2616_v52, 5  ;;  %v2742_v10 = vld [vmem:[#allocation2 + $0x20] sm:$0x1] }
  0xb2   : > { %v876_v21 = vsel %vm2677_vm0, %v871_v11, %v875_v53  ;;  %v837_v22 = vrot.slane %v836_v13, 4  ;;  %v992_v25 = vrot.slane %v2665_v34, 5  ;;  %v769_v14 = vrot.slane %v767_v61, 5  ;;  %v2733_v53 = vld [vmem:[#allocation2 + $0x1c] sm:$0xf] }
  0xb3   : > { %1132 = vrot.lane.b32.xlu0 %v1866_v16, %s2252_s9  ;;  %v2700_v27 = vcombine.low %v866_v60, %v876_v21  ;;  %v847_v28 = vrot.slane %v846_v17, 4  ;;  %v990_v52 = vsel %vm2636_vm13, %v1853_v15, %v989_v19  ;;  %v991_v29 = vrot.slane %v989_v19, 4 }
  0xb4   : > { %v842_v30 = vsel %vm2677_vm0, %v837_v22, %v841_v4  ;;  %v770_v31 = vsel %vm2677_vm0, %v2654_v24, %v769_v14  ;;  %v774_v61 = vor.u32 %v2633_v6, %v769_v14  ;;  %v777_v32 = vshll.u32 %v711_v20, 16 }
  0xb5   : > { %1219 = vrot.lane.b32.xlu1 %v2700_v27, %s2253_s29  ;;  %v852_v34 = vsel %vm2677_vm0, %v847_v28, %v851_v18  ;;  %v993_v37 = vsel %vm2636_vm13, %v991_v29, %v992_v25  ;;  %v878_v38 = vshrl.u32 %v702_v26, 16  ;;  %v881_v39 = vshll.u32 %v702_v26, 16 }
  0xb6   : > { %v2718_v41 = vcombine.low %v842_v30, %v852_v34  ;;  %v2720_v24 = vcombine.low %v990_v52, %v993_v37  ;;  %v775_v6 = vrot.slane %v774_v61, 4  ;;  %v779_v42 = vrot.slane %v777_v32, 5  ;;  %v2767_v37 = vld [vmem:[#allocation2 + $0x54] sm:$0xf] }
  0xb7   : > { %v880_v44 = vrot.slane %v878_v38, 4  ;;  %v883_v45 = vrot.slane %v881_v39, 5  ;;  %v891_v46 = vshrl.u32 %v2710_v33, 16  ;;  %v2726_v47 = vcombine.low %v702_v26, %v2710_v33  ;;  %v2771_v39 = vld [vmem:[#allocation2 + $0x58] sm:$0xf] }
  0xb8   : > { %1140 = vrot.lane.b32.xlu0 %v2718_v41, %s2252_s9  ;;  %v780_v50 = vsel %vm2677_vm0, %v775_v6, %v779_v42  ;;  %v1849_v51 = vrot.slane %v721_v40, 9  ;;  %v961_v54 = vrot.slane %v2622_v56, 5  ;;  %v964_v7 = vrot.slane %v711_v20, 5  ;;  %v726_v6 = vld [vmem:[#allocation2 + $0x48] sm:$0xe] }
  0xb9   : > { %1238 = vrot.lane.b32.xlu1 %v2720_v24, %s2254_s7  ;;  %v1867_v55 = vcombine.low %v770_v31, %v780_v50  ;;  %v884_v0 = vor.u32 %v883_v45, %v880_v44  ;;  %v887_v57 = vshll.u32 %v2710_v33, 16  ;;  %v893_v59 = vrot.slane %v891_v46, 4  ;;  %v2784_v50 = vld [vmem:[#allocation2 + $0x24] sm:$0xf] }
  0xba   : > { %v962_v60 = vsel %vm2636_vm13, %v1849_v51, %v961_v54  ;;  %v963_v62 = vrot.slane %v961_v54, 4  ;;  %v897_v63 = vshll.u32 %v2722_v43, 16  ;;  %v782_v3 = vshrl.u32 %v694_v49, 16  ;;  %v2786_v54 = vld [vmem:[#allocation2 + $0x28] sm:$0xf] }
  0xbb   : > { %v885_v56 = vrot.slane %v884_v0, 4  ;;  %v889_v4 = vrot.slane %v887_v57, 5  ;;  %v785_v5 = vshll.u32 %v694_v49, 16  ;;  %v795_v9 = vshrl.u32 %v2733_v53, 16 }
  0xbc   : > { %1211 = vrot.lane.b32.xlu0 %v1867_v55, %s2253_s29  ;;  %v965_v11 = vsel %vm2636_vm13, %v963_v62, %v964_v7  ;;  %v784_v13 = vrot.slane %v782_v3, 4  ;;  %v899_v17 = vrot.slane %v897_v63, 5  ;;  %v791_v19 = vshll.u32 %v2733_v53, 16 }
  0xbd   : > { %1258 = vrot.lane.b32.xlu1 %v2726_v47, %s2255_s27  ;;  %v1875_v15 = vcombine.low %v962_v60, %v965_v11  ;;  %v894_v16 = vor.u32 %v893_v59, %v889_v4  ;;  %v787_v18 = vrot.slane %v785_v5, 5  ;;  %v797_v20 = vrot.slane %v795_v9, 4  ;;  %v722_v59 = vld [vmem:[#allocation2 + $0x18] sm:$0xe] }
  0xbe   : > { %v801_v21 = vshll.u32 %v2742_v10, 16  ;;  %v890_v22 = vsel %vm2677_vm0, %v885_v56, %v889_v4  ;;  %v2755_v26 = vcombine.low %v694_v49, %v2733_v53  ;;  %v793_v28 = vrot.slane %v791_v19, 5  ;;  %v2794_v56 = vld [vmem:[#allocation2 + $0x5c] sm:$0x1] }
  0xbf   : > { %v895_v25 = vrot.slane %v894_v16, 4  ;;  %v788_v14 = vor.u32 %v787_v18, %v784_v13  ;;  %v996_v42 = vrot.slane %v2710_v33, 5  ;;  %v902_v44 = vshrl.u32 %v2767_v37, 16 }
  0xc0   : > { %1230 = vrot.lane.b32.xlu0 %v1875_v15, %s2254_s7  ;;  %v798_v31 = vor.u32 %v797_v20, %v793_v28  ;;  %v803_v61 = vrot.slane %v801_v21, 5  ;;  %v905_v45 = vshll.u32 %v2767_v37, 16  ;;  %v915_v46 = vshrl.u32 %v2771_v39, 16 }
  0xc1   : > { %v900_v52 = vsel %vm2677_vm0, %v895_v25, %v899_v17  ;;  %v789_v29 = vrot.slane %v788_v14, 4  ;;  %v911_v49 = vshll.u32 %v2771_v39, 16  ;;  %v1854_v51 = vrot.slane %v726_v6, 9  ;;  %v2812_v14 = vld [vmem:[#allocation2 + $0x2c] sm:$0x1] }
  0xc2   : > { %v2759_v30 = vcombine.low %v890_v22, %v900_v52  ;;  %v799_v34 = vrot.slane %v798_v31, 4  ;;  %v998_v33 = vrot.slane %v996_v42, 4  ;;  %v999_v7 = vrot.slane %v2722_v43, 5 }
  0xc3   : > { %v794_v32 = vsel %vm2677_vm0, %v789_v29, %v793_v28  ;;  %v904_v0 = vrot.slane %v902_v44, 4  ;;  %v907_v57 = vrot.slane %v905_v45, 5  ;;  %v968_v60 = vrot.slane %v2733_v53, 5 }
  0xc4   : > { %1277 = vrot.lane.b32.xlu1 %v2759_v30, %s2256_s10  ;;  %1250 = vrot.lane.b32.xlu0 %v2755_v26, %s2255_s27  ;;  %v804_v38 = vsel %vm2677_vm0, %v799_v34, %v803_v61  ;;  %v913_v62 = vrot.slane %v911_v49, 5  ;;  %v917_v63 = vrot.slane %v915_v46, 4  ;;  %v806_v3 = vshrl.u32 %v2784_v50, 16 }
  0xc5   : > { %v2773_v40 = vcombine.low %v794_v32, %v804_v38  ;;  %v809_v4 = vshll.u32 %v2784_v50, 16  ;;  %v819_v5 = vshrl.u32 %v2786_v54, 16  ;;  %v815_v9 = vshll.u32 %v2786_v54, 16  ;;  %v2082_v38 = vld [vmem:[%s3245_s1 + $0x8] sm:$0xff]  }
  0xc6   : > { %v997_v43 = vsel %vm2636_vm13, %v1854_v51, %v996_v42  ;;  %v1000_v53 = vsel %vm2636_vm13, %v998_v33, %v999_v7  ;;  %v971_v11 = vrot.slane %v2742_v10, 5  ;;  %v908_v13 = vor.u32 %v907_v57, %v904_v0  ;;  %v2081_v10 = vld [vmem:[%s3245_s1] sm:$0xff]  }
  0xc7   : > { %v970_v16 = vrot.slane %v968_v60, 4  ;;  %v918_v17 = vor.u32 %v917_v63, %v913_v62  ;;  %v921_v18 = vshll.u32 %v2794_v56, 16  ;;  %v808_v19 = vrot.slane %v806_v3, 4  ;;  %v2887_v63 = vld [vmem:[#allocation2 + $0x64] sm:$0xf] }
  0xc8   : > { %1142 = vrot.lane.b32.xlu1 %v2700_v27, %s2252_s9  ;;  %1269 = vrot.lane.b32.xlu0 %v2773_v40, %s2256_s10  ;;  %v811_v20 = vrot.slane %v809_v4, 5  ;;  %v817_v21 = vrot.slane %v815_v9, 5  ;;  %v821_v22 = vrot.slane %v819_v5, 4  ;;  %v2810_v25 = vcombine.low %v2667_v35, %v2641_v12  ;;  %v2085_v3 = vld [vmem:[%s3245_s1 + $0x20] sm:$0xff]   ;;  %v727_v5 = vld [vmem:[#allocation2 + $0x54] sm:$0xe] }
  0xc9   : > { %v909_v52 = vrot.slane %v908_v13, 4  ;;  %v919_v12 = vrot.slane %v918_v17, 4  ;;  %v923_v35 = vrot.slane %v921_v18, 5  ;;  %v972_v29 = vsel %vm2636_vm13, %v970_v16, %v971_v11 }
  0xca   : > { %v812_v31 = vor.u32 %v811_v20, %v808_v19  ;;  %v822_v61 = vor.u32 %v821_v22, %v817_v21  ;;  %v825_v32 = vshll.u32 %v2812_v14, 16  ;;  %v2257_v34 = vmov 0   ;;  %v723_v22 = vld [vmem:[#allocation2 + $0x24] sm:$0xe] }
  0xcb   : > { %1938 = vmatprep.subr.bf16.mxu1 %v2257_v34  ;;  %1519 = vmatprep.subr.bf16.mxu0 %v2257_v34  ;;  %v2837_v6 = vcombine.low %v2767_v37, %v2771_v39  ;;  %v914_v44 = vsel %vm2677_vm0, %v909_v52, %v913_v62  ;;  %v924_v45 = vsel %vm2677_vm0, %v919_v12, %v923_v35  ;;  %v2083_v37 = vld [vmem:[%s3245_s1 + $0x10] sm:$0xff]   ;;  %vm1288_vm1 = vcmask 130048   ;;  %v2885_v62 = vld [vmem:[#allocation2 + $0x60] sm:$0xf] }
  0xcc   : > { %1182 = vrot.lane.b32.xlu1 %v2720_v24, %s2251_s26  ;;  %1134 = vrot.lane.b32.xlu0 %v1867_v55, %s2252_s9  ;;  %v1850_v55 = vrot.slane %v722_v59, 9  ;;  %v813_v46 = vrot.slane %v812_v31, 4  ;;  %v823_v49 = vrot.slane %v822_v61, 4  ;;  %v827_v51 = vrot.slane %v825_v32, 5 }
  0xcd   : > { %1947 = vmatpush1.bf16.msra.mxu1 %v2081_v10  ;;  %1520 = vmatpush1.bf16.msra.mxu0 %v2081_v10  ;;  %v1858_v33 = vcombine.low %v2652_v23, %v2624_v58  ;;  %v2856_v7 = vcombine.low %v914_v44, %v924_v45  ;;  %v2863_v0 = vcombine.low %v2784_v50, %v2786_v54  ;;  %v2084_v50 = vld [vmem:[%s3245_s1 + $0x18] sm:$0xff]   ;;  %v1003_v4 = vrot.slane %v2771_v39, 5  ;;  %v2090_v44 = vld [vmem:[%s3245_s1 + $0x40] sm:$0xff]  }
  0xce   : > { %v969_v28 = vsel %vm2636_vm13, %v1850_v55, %v968_v60  ;;  %1939 = vmatprep.subr.bf16.mxu1 %v2257_v34  ;;  %1521 = vmatprep.subr.bf16.mxu0 %v2257_v34  ;;  %v818_v57 = vsel %vm2677_vm0, %v813_v46, %v817_v21  ;;  %v828_v59 = vsel %vm2677_vm0, %v823_v49, %v827_v51  ;;  %v1009_v9 = vshrl.u32 %v2885_v62, 16  ;;  %v2914_v21 = vld [vmem:[#allocation2 + $0x68] sm:$0x1] }
  0xcf   : > { %v2842_v42 = vcombine.low %v969_v28, %v972_v29  ;;  %v2882_v60 = vcombine.low %v818_v57, %v828_v59  ;;  %v1018_v55 = vshll.u32 %v2887_v63, 16  ;;  %v1855_v39 = vrot.slane %v727_v5, 9  ;;  %v2089_v29 = vld [vmem:[%s3245_s1 + $0x38] sm:$0xff]   ;;  %v708_v57 = vld [vmem:[#allocation2 + $0x6c] sm:$0xf] }
  0xd0   : > { %1202 = vrot.lane.b32.xlu1 %v2726_v47, %s2250_s18  ;;  %1174 = vrot.lane.b32.xlu0 %v1875_v15, %s2251_s26  ;;  %v2819_v15 = vcombine.low %v997_v43, %v1000_v53  ;;  %v1012_v43 = vshll.u32 %v2885_v62, 16  ;;  %v1022_v53 = vshrl.u32 %v2887_v63, 16  ;;  %v1005_v11 = vrot.slane %v1003_v4, 4  ;;  %v709_v59 = vld [vmem:[#allocation2 + $0x70] sm:$0xf] }
  0xd1   : > { %1948 = vmatpush1.bf16.msra.mxu1 %v2082_v38  ;;  %1522 = vmatpush1.bf16.msra.mxu0 %v2082_v38  ;;  %v1006_v13 = vrot.slane %v2794_v56, 5  ;;  %v1011_v16 = vrot.slane %v1009_v9, 4  ;;  %v1020_v18 = vrot.slane %v1018_v55, 5  ;;  %v975_v20 = vrot.slane %v2786_v54, 5  ;;  %v2088_v56 = vld [vmem:[%s3245_s1 + $0x30] sm:$0xff]  }
  0xd2   : > { %1940 = vmatprep.subr.bf16.mxu1 %v2257_v34  ;;  %1523 = vmatprep.subr.bf16.mxu0 %v2257_v34  ;;  %v1014_v17 = vrot.slane %v1012_v43, 5  ;;  %v1024_v19 = vrot.slane %v1022_v53, 4  ;;  %v1028_v28 = vshll.u32 %v2914_v21, 16  ;;  %v1851_v52 = vrot.slane %v723_v22, 9 }
  0xd3   : > { %1901 = vmatprep.mubr.msk.bf16.mxu1 %vm1288_vm1, %v2819_v15  ;;  %1897 = vmatprep.mubr.msk.bf16.mxu0 %vm1288_vm1, %v2842_v42  ;;  %v1007_v54 = vsel %vm2636_vm13, %v1005_v11, %v1006_v13  ;;  %v977_v12 = vrot.slane %v975_v20, 4  ;;  %v978_v35 = vrot.slane %v2812_v14, 5  ;;  %v1882_v45 = vcombine.low %v2885_v62, %v2887_v63  ;;  %v728_v62 = vld [vmem:[#allocation2 + $0x60] sm:$0xe] }
  0xd4   : > { %1221 = vrot.lane.b32.xlu1 %v2759_v30, %s2253_s29  ;;  %1194 = vrot.lane.b32.xlu0 %v2755_v26, %s2250_s18  ;;  %v1015_v10 = vor.u32 %v1014_v17, %v1011_v16  ;;  %v1030_v38 = vrot.slane %v1028_v28, 5  ;;  %v976_v14 = vsel %vm2636_vm13, %v1851_v52, %v975_v20  ;;  %v1052_v5 = vshll.u32 %v709_v59, 16  ;;  %v729_v16 = vld [vmem:[#allocation2 + $0x6c] sm:$0xe] }
  0xd5   : > { %1949 = vmatpush1.bf16.msra.mxu1 %v2083_v37  ;;  %1524 = vmatpush1.bf16.msra.mxu0 %v2083_v37  ;;  %v1071_v9 = vrot.slane %v709_v59, 5  ;;  %v1856_v43 = vrot.slane %v728_v62, 9  ;;  %v1040_v55 = vrot.slane %v2914_v21, 5  ;;  %v1857_v17 = vrot.slane %v729_v16, 9 }
  0xd6   : > { %1941 = vmatprep.subr.bf16.mxu1 %v2257_v34  ;;  %1525 = vmatprep.subr.bf16.mxu0 %v2257_v34  ;;  %v1016_v61 = vrot.slane %v1015_v10, 4  ;;  %vm1313_vm2 = vcmask 261120   ;;  %vm1330_vm3 = vcmask 392192   ;;  %vm1347_vm4 = vcmask 523264  }
  0xd7   : > { %vm1364_vm5 = vcmask 654336   ;;  %vm1381_vm6 = vcmask 785408   ;;  %vm1398_vm7 = vcmask 916480  }
  0xd8   : > { %1240 = vrot.lane.b32.xlu1 %v2819_v15, %s2254_s7  ;;  %1213 = vrot.lane.b32.xlu0 %v2773_v40, %s2253_s29  ;;  %v1021_v49 = vsel %vm2677_vm0, %v1016_v61, %v1020_v18 }
  0xd9   : > { %1950 = vmatpush1.bf16.msra.mxu1 %v2084_v50  ;;  %1526 = vmatpush1.bf16.msra.mxu0 %v2084_v50  ;;  %v1043_v50 = vshrl.u32 %v708_v57, 16 }
  0xda   : > { %1942 = vmatprep.subr.bf16.mxu1 %v2257_v34  ;;  %1527 = vmatprep.subr.bf16.mxu0 %v2257_v34 }
  0xdc   : > { %1260 = vrot.lane.b32.xlu1 %v2837_v6, %s2255_s27  ;;  %1232 = vrot.lane.b32.xlu0 %v2842_v42, %s2254_s7 }
  0xdd   : > { %1951 = vmatpush1.bf16.msra.mxu1 %v2085_v3  ;;  %1528 = vmatpush1.bf16.msra.mxu0 %v2085_v3  ;;  %v1046_v3 = vshll.u32 %v708_v57, 16 }
  0xde   : > { %1943 = vmatprep.subr.bf16.mxu1 %v2257_v34  ;;  %1529 = vmatprep.subr.bf16.mxu0 %v2257_v34 }
  0xe0   : > { %1279 = vrot.lane.b32.xlu1 %v2856_v7, %s2256_s10  ;;  %1252 = vrot.lane.b32.xlu0 %v2863_v0, %s2255_s27 }
  0xe4   : > { %1144 = vrot.lane.b32.xlu1 %v2759_v30, %s2252_s9  ;;  %1271 = vrot.lane.b32.xlu0 %v2882_v60, %s2256_s10  ;;  %v2087_v30 = vld [vmem:[%s3245_s1 + $0x28] sm:$0xff]  }
  0xe5   : > { %1952 = vmatpush1.bf16.msra.mxu1 %v2087_v30  ;;  %1530 = vmatpush1.bf16.msra.mxu0 %v2087_v30  ;;  %v1045_v30 = vrot.slane %v1043_v50, 4 }
  0xe6   : > { %1944 = vmatprep.subr.bf16.mxu1 %v2257_v34  ;;  %1531 = vmatprep.subr.bf16.mxu0 %v2257_v34 }
  0xe8   : > { %1184 = vrot.lane.b32.xlu1 %v2819_v15, %s2251_s26  ;;  %1136 = vrot.lane.b32.xlu0 %v2773_v40, %s2252_s9  ;;  %v1004_v40 = vsel %vm2636_vm13, %v1855_v39, %v1003_v4  ;;  %v1025_v15 = vor.u32 %v1024_v19, %v1020_v18  ;;  %v1056_v4 = vshrl.u32 %v709_v59, 16  ;;  %v1054_v39 = vrot.slane %v1052_v5, 5 }
  0xe9   : > { %1953 = vmatpush1.bf16.msra.mxu1 %v2088_v56  ;;  %1532 = vmatpush1.bf16.msra.mxu0 %v2088_v56  ;;  %v2936_v31 = vcombine.low %v1004_v40, %v1007_v54  ;;  %v1073_v18 = vrot.slane %v1071_v9, 4  ;;  %v2988_v56 = vsel %vm2636_vm13, %v1857_v17, %v1071_v9 }
  0xea   : > { %1945 = vmatprep.subr.bf16.mxu1 %v2257_v34  ;;  %v1026_v32 = vrot.slane %v1025_v15, 4  ;;  %1533 = vmatprep.subr.bf16.mxu0 %v2257_v34  ;;  %v1058_v11 = vrot.slane %v1056_v4, 4 }
  0xec   : > { %1204 = vrot.lane.b32.xlu1 %v2837_v6, %s2250_s18  ;;  %1176 = vrot.lane.b32.xlu0 %v2842_v42, %s2251_s26  ;;  %v979_v42 = vsel %vm2636_vm13, %v977_v12, %v978_v35  ;;  %v1031_v51 = vsel %vm2677_vm0, %v1026_v32, %v1030_v38  ;;  %v1059_v22 = vor.u32 %v1058_v11, %v1054_v39 }
  0xed   : > { %1954 = vmatpush1.bf16.msra.mxu1 %v2089_v29  ;;  %1534 = vmatpush1.bf16.msra.mxu0 %v2089_v29  ;;  %v2956_v46 = vcombine.low %v976_v14, %v979_v42  ;;  %v1883_v37 = vcombine.low %v1021_v49, %v1031_v51  ;;  %v1885_v12 = vcombine.low %v708_v57, %v709_v59 }
  0xee   : > { %1946 = vmatprep.subr.bf16.mxu1 %v2257_v34  ;;  %1535 = vmatprep.subr.bf16.mxu0 %v2257_v34  ;;  %v1037_v34 = vrot.slane %v2887_v63, 5  ;;  %v1048_v63 = vrot.slane %v1046_v3, 5  ;;  %v1060_v28 = vrot.slane %v1059_v22, 4 }
  0xf0   : > { %1223 = vrot.lane.b32.xlu1 %v2856_v7, %s2253_s29  ;;  %1196 = vrot.lane.b32.xlu0 %v2863_v0, %s2250_s18  ;;  %v1039_v53 = vrot.slane %v1037_v34, 4  ;;  %v1038_v19 = vsel %vm2636_vm13, %v1856_v43, %v1037_v34 }
  0xf1   : > { %1955 = vmatpush1.bf16.msra.mxu1 %v2090_v44  ;;  %1536 = vmatpush1.bf16.msra.mxu0 %v2090_v44 }
  0xf2   : > { %v1041_v20 = vsel %vm2636_vm13, %v1039_v53, %v1040_v55 }
  0xf3   : > { %v2997_v10 = vcombine.low %v1038_v19, %v1041_v20 }
  0xf4   : > { %1242 = vrot.lane.b32.xlu1 %v2936_v31, %s2254_s7  ;;  %1215 = vrot.lane.b32.xlu0 %v2882_v60, %s2253_s29 }
  0xf8   : > { %1262 = vrot.lane.b32.xlu1 %v1882_v45, %s2255_s27  ;;  %1234 = vrot.lane.b32.xlu0 %v2956_v46, %s2254_s7 }
  0xfc   : > { %1281 = vrot.lane.b32.xlu1 %v1883_v37, %s2256_s10  ;;  %1254 = vrot.lane.b32.xlu0 %v2810_v25, %s2255_s27 }
 0x100   : > { %1146 = vrot.lane.b32.xlu1 %v2856_v7, %s2252_s9  ;;  %1273 = vrot.lane.b32.xlu0 %v2718_v41, %s2256_s10  ;;  %v719_v7 = vld [vmem:[#allocation2 + $0x74] sm:$0x1] }
 0x101   : > { %v1074_v13 = vrot.slane %v719_v7, 5  ;;  %v1062_v21 = vshll.u32 %v719_v7, 16 }
 0x103   : > { %v2992_v40 = vsel %vm2636_vm13, %v1073_v18, %v1074_v13  ;;  %v1064_v52 = vrot.slane %v1062_v21, 5 }
 0x104   : > { %1186 = vrot.lane.b32.xlu1 %v2936_v31, %s2251_s26  ;;  %1138 = vrot.lane.b32.xlu0 %v2882_v60, %s2252_s9  ;;  %v1049_v60 = vor.u32 %v1048_v63, %v1045_v30  ;;  %v1887_v54 = vcombine.low %v2988_v56, %v2992_v40  ;;  %s2258_s9 = smov [#allocation6]  }
 0x105   : > { %v1065_v35 = vsel %vm2677_vm0, %v1060_v28, %v1064_v52 }
 0x106   : > { %v1050_v15 = vrot.slane %v1049_v60, 4 }
 0x108   : > { %1206 = vrot.lane.b32.xlu1 %v1882_v45, %s2250_s18  ;;  %1178 = vrot.lane.b32.xlu0 %v2956_v46, %s2251_s26  ;;  %v1055_v8 = vsel %vm2677_vm0, %v1050_v15, %v1054_v39 }
 0x109   : > { %v1886_v29 = vcombine.low %v1055_v8, %v1065_v35 }
 0x10c   : > { %1225 = vrot.lane.b32.xlu1 %v1883_v37, %s2253_s29  ;;  %1198 = vrot.lane.b32.xlu0 %v2810_v25, %s2250_s18  ;;  %s3183_s18 = scalar_lea.sflag [#allocation5], %s227_s28 }
 0x110   : > { %1244 = vrot.lane.b32.xlu1 %v2997_v10, %s2254_s7  ;;  %1217 = vrot.lane.b32.xlu0 %v2718_v41, %s2253_s29  ;;  %s2125_s29 = sshll.u32 %s2258_s9, 4  ;;  %s2126_s29 = int_to_ptr.vmem [resolvable:$false] %s2125_s29 }
 0x113   : > { %v1201_v61 = vpop.permute.xlu1 %1200 }
 0x114   : > { %1264 = vrot.lane.b32.xlu1 %v1885_v12, %s2255_s27  ;;  %1236 = vrot.lane.b32.xlu0 %v2669_v36, %s2254_s7  ;;  %s1937_s7 = sshll.u32 %s2227_s21, 4 }
 0x116   : > { %v1193_v41 = vpop.permute.xlu0 %1192 }
 0x118   : > { %1283 = vrot.lane.b32.xlu1 %v1886_v29, %s2256_s10  ;;  %1256 = vrot.lane.b32.xlu0 %v2620_v2, %s2255_s27  ;;  %s1910_s27 = sshll.u32 %s2231_s22, 5  ;;  %s1711_s22 = sshll.u32 %s2499_s8, 4  ;;  %s3175_s22 = int_to_ptr.vmem [resolvable:$true] %s1711_s22 }
 0x119   : > { %s2121_s26 = scalar_lea.vmem %s3175_s22, 2048  ;;  %p2128_p3 = scmp.lt.s32.totalorder %s3175_s22, %s2126_s29 }
 0x11a   : > { %p2122_p0 = scmp.ne.s32.totalorder %s3175_s22, %s2121_s26 }
 0x11c   : > { %v1173_v32 = vpop.permute.xlu1 %1172  ;;  %1275 = vrot.lane.b32.xlu0 %v2700_v27, %s2256_s10  ;;  %s1708_s10 = sadd.s32 %s1937_s7, %s1910_s27  ;;  %p2123_p6 = pnand %p2122_p0, %p3272_p1 }
 0x11d   : > { %s1911_s21 = sshll.u32 %s1708_s10, 7  ;;  %s2127_s7 = scalar_lea.vmem %s2126_s29, 4096 }
 0x11e   : > { %s3173_s30 = scalar_lea.hbm %s3248_s4, %s1911_s21  ;;  %p2124_p9 = pneg %p2123_p6 }
 0x11f   : > { %p2129_p11 = scmp.lt.s32.totalorder %s2127_s7, %s2121_s26 }
 0x120   : > { %v1181_v38 = vpop.permute.xlu1 %1180 }
 0x121   : > { %p2130_p13 = por %p2129_p11, %p2128_p3 }
 0x123   : > { %p2131_p5 = pnand %p2130_p13, %p2124_p9 }
 0x125   : > { %v1133_v48 = vpop.permute.xlu0 %1132 }
 0x126   : > { %v1291_v27 = vsel %vm1288_vm1, %v1858_v33, %v1133_v48 }
 0x127   : > { %v1220_v14 = vpop.permute.xlu1 %1219 }
 0x12a   : > { %v1141_v42 = vpop.permute.xlu0 %1140 }
 0x12b   : > { %v1303_v44 = vsel %vm1288_vm1, %v2810_v25, %v1141_v42  ;;  %v1239_v45 = vpop.permute.xlu1 %1238  ;;  %v1315_v25 = vsel %vm1313_vm2, %v1291_v27, %v1173_v32 }
 0x12c   : > { %v1323_v49 = vsel %vm1313_vm2, %v1303_v44, %v1181_v38  ;;  %v1332_v58 = vsel %vm1330_vm3, %v1315_v25, %v1193_v41 }
 0x12d   : > { %v1340_v37 = vsel %vm1330_vm3, %v1323_v49, %v1201_v61 }
 0x12e   : > { %v1212_v51 = vpop.permute.xlu0 %1211  ;;  %v1357_v59 = vsel %vm1347_vm4, %v1340_v37, %v1220_v14 }
 0x12f   : > { %v1259_v57 = vpop.permute.xlu1 %1258  ;;  %v1374_v50 = vsel %vm1364_vm5, %v1357_v59, %v1239_v45  ;;  %v1349_v23 = vsel %vm1347_vm4, %v1332_v58, %v1212_v51 }
 0x130   : > { %v1391_v62 = vsel %vm1381_vm6, %v1374_v50, %v1259_v57 }
 0x132   : > { %v1231_v34 = vpop.permute.xlu0 %1230 }
 0x133   : > { %v1366_v33 = vsel %vm1364_vm5, %v1349_v23, %v1231_v34 }
 0x136   : > { %v1278_v3 = vpop.permute.xlu1 %1277  ;;  %v1251_v4 = vpop.permute.xlu0 %1250 }
 0x137   : > { %v1412_v5 = vsel %vm1398_vm7, %v1391_v62, %v1278_v3  ;;  %v1383_v43 = vsel %vm1381_vm6, %v1366_v33, %v1251_v4 }
 0x138   : > { %1584 = vmatmul.mubr.bf16.vlgmr.msra.gmra.mrb[0].mxu1 %v1412_v5 }
 0x139   : > { %1902 = vmatprep.mubr.msk.bf16.mxu1 %vm1288_vm1, %v2936_v31 }
 0x13a   : > { %v1143_v9 = vpop.permute.xlu1 %1142  ;;  %v1270_v53 = vpop.permute.xlu0 %1269 }
 0x13b   : > { %v1400_v55 = vsel %vm1398_vm7, %v1383_v43, %v1270_v53  ;;  %v1306_v31 = vsel %vm1288_vm1, %v2620_v2, %v1143_v9 }
 0x13c   : > { %1552 = vmatmul.mubr.bf16.vlgmr.msra.gmra.mrb[0].mxu0 %v1400_v55 }
 0x13d   : > { %1898 = vmatprep.mubr.msk.bf16.mxu0 %vm1288_vm1, %v2956_v46 }
 0x13e   : > { %v1183_v30 = vpop.permute.xlu1 %1182  ;;  %v1135_v7 = vpop.permute.xlu0 %1134 }
 0x13f   : > { %v1325_v18 = vsel %vm1313_vm2, %v1306_v31, %v1183_v30  ;;  %v1294_v22 = vsel %vm1288_vm1, %v2631_v1, %v1135_v7 }
 0x142   : > { %v1203_v63 = vpop.permute.xlu1 %1202  ;;  %v1175_v39 = vpop.permute.xlu0 %1174 }
 0x143   : > { %v1342_v20 = vsel %vm1330_vm3, %v1325_v18, %v1203_v63  ;;  %v1317_v52 = vsel %vm1313_vm2, %v1294_v22, %v1175_v39 }
 0x146   : > { %v1222_v11 = vpop.permute.xlu1 %1221  ;;  %v1195_v13 = vpop.permute.xlu0 %1194 }
 0x147   : > { %v1359_v60 = vsel %vm1347_vm4, %v1342_v20, %v1222_v11  ;;  %v1334_v8 = vsel %vm1330_vm3, %v1317_v52, %v1195_v13 }
 0x14a   : > { %v1241_v16 = vpop.permute.xlu1 %1240  ;;  %v1214_v17 = vpop.permute.xlu0 %1213 }
 0x14b   : > { %v1376_v46 = vsel %vm1364_vm5, %v1359_v60, %v1241_v16  ;;  %v1351_v35 = vsel %vm1347_vm4, %v1334_v8, %v1214_v17  ;;  %v3105_v8 = vld [vmem:[%s3247_s3] ss:$0 sm:$0xff] }
 0x14e   : > { %v1261_v19 = vpop.permute.xlu1 %1260  ;;  %v1233_v21 = vpop.permute.xlu0 %1232 }
 0x14f   : > { %v1393_v15 = vsel %vm1381_vm6, %v1376_v46, %v1261_v19  ;;  %v1368_v29 = vsel %vm1364_vm5, %v1351_v35, %v1233_v21 }
 0x152   : > { %v1280_v28 = vpop.permute.xlu1 %1279  ;;  %v1253_v2 = vpop.permute.xlu0 %1252 }
 0x153   : > { %v1415_v12 = vsel %vm1398_vm7, %v1393_v15, %v1280_v28  ;;  %v1385_v1 = vsel %vm1381_vm6, %v1368_v29, %v1253_v2  ;;  %v3100_v2 = vld [vmem:[%s3246_s2] ss:$0 sm:$0xff] }
 0x154   : > { %1592 = vmatmul.mubr.bf16.gmra.mrb[4].mxu1 %v1415_v12 }
 0x155   : > { %1903 = vmatprep.mubr.msk.bf16.mxu1 %vm1288_vm1, %v2997_v10 }
 0x156   : > { %v1145_v61 = vpop.permute.xlu1 %1144  ;;  %v1272_v32 = vpop.permute.xlu0 %1271 }
 0x157   : > { %v1403_v41 = vsel %vm1398_vm7, %v1385_v1, %v1272_v32  ;;  %v1309_v10 = vsel %vm1288_vm1, %v2726_v47, %v1145_v61 }
 0x158   : > { %1560 = vmatmul.mubr.bf16.gmra.mrb[4].mxu0 %v1403_v41 }
 0x159   : > { %1899 = vmatprep.mubr.msk.bf16.mxu0 %vm1288_vm1, %v2669_v36 }
 0x15a   : > { %v1185_v38 = vpop.permute.xlu1 %1184  ;;  %v1137_v48 = vpop.permute.xlu0 %1136 }
 0x15b   : > { %v1327_v37 = vsel %vm1313_vm2, %v1309_v10, %v1185_v38  ;;  %v1297_v25 = vsel %vm1288_vm1, %v2755_v26, %v1137_v48 }
 0x15e   : > { %v1205_v14 = vpop.permute.xlu1 %1204  ;;  %v1177_v42 = vpop.permute.xlu0 %1176 }
 0x15f   : > { %v1344_v27 = vsel %vm1330_vm3, %v1327_v37, %v1205_v14  ;;  %v1319_v3 = vsel %vm1313_vm2, %v1297_v25, %v1177_v42 }
 0x162   : > { %v1224_v44 = vpop.permute.xlu1 %1223  ;;  %v1197_v45 = vpop.permute.xlu0 %1196 }
 0x163   : > { %v1361_v34 = vsel %vm1347_vm4, %v1344_v27, %v1224_v44  ;;  %v1336_v5 = vsel %vm1330_vm3, %v1319_v3, %v1197_v45 }
 0x166   : > { %v1243_v49 = vpop.permute.xlu1 %1242  ;;  %v1216_v51 = vpop.permute.xlu0 %1215 }
 0x167   : > { %v1378_v36 = vsel %vm1364_vm5, %v1361_v34, %v1243_v49  ;;  %v1353_v58 = vsel %vm1347_vm4, %v1336_v5, %v1216_v51 }
 0x16a   : > { %v1263_v57 = vpop.permute.xlu1 %1262  ;;  %v1235_v59 = vpop.permute.xlu0 %1234 }
 0x16b   : > { %v1395_v50 = vsel %vm1381_vm6, %v1378_v36, %v1263_v57  ;;  %v1370_v26 = vsel %vm1364_vm5, %v1353_v58, %v1235_v59 }
 0x16e   : > { %v1282_v62 = vpop.permute.xlu1 %1281  ;;  %v1255_v47 = vpop.permute.xlu0 %1254 }
 0x16f   : > { %v1418_v4 = vsel %vm1398_vm7, %v1395_v50, %v1282_v62  ;;  %v1387_v33 = vsel %vm1381_vm6, %v1370_v26, %v1255_v47 }
 0x170   : > { %1600 = vmatmul.mubr.bf16.gmra.mrb[8].mxu1 %v1418_v4 }
 0x171   : > { %1904 = vmatprep.mubr.msk.bf16.mxu1 %vm1288_vm1, %v1887_v54 }
 0x172   : > { %v1147_v23 = vpop.permute.xlu1 %1146  ;;  %v1274_v9 = vpop.permute.xlu0 %1273 }
 0x173   : > { %v1406_v43 = vsel %vm1398_vm7, %v1387_v33, %v1274_v9  ;;  %v1312_v54 = vsel %vm1288_vm1, %v2837_v6, %v1147_v23 }
 0x174   : > { %1568 = vmatmul.mubr.bf16.gmra.mrb[8].mxu0 %v1406_v43 }
 0x175   : > { %1900 = vmatprep.mubr.msk.bf16.mxu0 %vm1288_vm1, %v2720_v24 }
 0x176   : > { %v1187_v53 = vpop.permute.xlu1 %1186  ;;  %v1139_v55 = vpop.permute.xlu0 %1138 }
 0x177   : > { %v1329_v11 = vsel %vm1313_vm2, %v1312_v54, %v1187_v53  ;;  %v1300_v18 = vsel %vm1288_vm1, %v2863_v0, %v1139_v55 }
 0x17a   : > { %v1207_v30 = vpop.permute.xlu1 %1206  ;;  %v1179_v7 = vpop.permute.xlu0 %1178 }
 0x17b   : > { %v1346_v16 = vsel %vm1330_vm3, %v1329_v11, %v1207_v30  ;;  %v1321_v21 = vsel %vm1313_vm2, %v1300_v18, %v1179_v7 }
 0x17e   : > { %v1226_v63 = vpop.permute.xlu1 %1225  ;;  %v1199_v56 = vpop.permute.xlu0 %1198 }
 0x17f   : > { %v1363_v17 = vsel %vm1347_vm4, %v1346_v16, %v1226_v63  ;;  %v1338_v46 = vsel %vm1330_vm3, %v1321_v21, %v1199_v56 }
 0x182   : > { %v1245_v40 = vpop.permute.xlu1 %1244  ;;  %v1218_v39 = vpop.permute.xlu0 %1217 }
 0x183   : > { %v1380_v24 = vsel %vm1364_vm5, %v1363_v17, %v1245_v40  ;;  %v1355_v22 = vsel %vm1347_vm4, %v1338_v46, %v1218_v39 }
 0x186   : > { %v1265_v13 = vpop.permute.xlu1 %1264  ;;  %v1237_v31 = vpop.permute.xlu0 %1236 }
 0x187   : > { %v1397_v19 = vsel %vm1381_vm6, %v1380_v24, %v1265_v13  ;;  %v1372_v15 = vsel %vm1364_vm5, %v1355_v22, %v1237_v31 }
 0x18a   : > { %v1284_v20 = vpop.permute.xlu1 %1283  ;;  %v1257_v6 = vpop.permute.xlu0 %1256 }
 0x18b   : > { %v1421_v60 = vsel %vm1398_vm7, %v1397_v19, %v1284_v20  ;;  %v1389_v28 = vsel %vm1381_vm6, %v1372_v15, %v1257_v6 }
 0x18c   : > { %1608 = vmatmul.mubr.bf16.gmra.mrb[12].mxu1 %v1421_v60 }
 0x18e   : > { %v1276_v52 = vpop.permute.xlu0 %1275 }
 0x18f   : > { %v1409_v0 = vsel %vm1398_vm7, %v1389_v28, %v1276_v52 }
 0x190   : > { %1576 = vmatmul.mubr.bf16.gmra.mrb[12].mxu0 %v1409_v0 }
 0x20b   : > { %v1585_v12 = vpop.f32.mrb[0].mxu1 }
 0x20c   : > { %v1631_v35 = vmul.f32 %v3100_v2, %v1585_v12  ;;  %v1587_v29 = vpop.f32.mrb[1].mxu1 }
 0x20d   : > { %v1588_v61 = vpop.f32.mrb[2].mxu1 }
 0x20e   : > { %v1654_v1 = vadd.f32 %v3105_v8, %v1631_v35  ;;  %v1632_v32 = vmul.f32 %v3100_v2, %v1588_v61  ;;  %v1590_v41 = vpop.f32.mrb[3].mxu1 }
 0x20f   : > { %v1553_v14 = vpop.f32.mrb[0].mxu0 }
 0x210   : > { %v1670_v38 = vmax.f32 %v1654_v1, 0.0  ;;  %v1655_v48 = vadd.f32 %v3105_v8, %v1632_v32  ;;  %v1623_v42 = vmul.f32 %v3100_v2, %v1553_v14  ;;  %v1555_v44 = vpop.f32.mrb[1].mxu0 }
 0x211   : > { %v1556_v49 = vpop.f32.mrb[2].mxu0 }
 0x212   : > { %1686 = vst.msk [vmem:[%s2499_s8 + $0x40] sm:$0xff] %vm1313_vm2, %v1670_v38  ;;  %v1671_v45 = vmax.f32 %v1655_v48, 0.0  ;;  %v1646_v10 = vadd.f32 %v3105_v8, %v1623_v42  ;;  %v1624_v51 = vmul.f32 %v3100_v2, %v1556_v49  ;;  %v1558_v37 = vpop.f32.mrb[3].mxu0 }
 0x214   : > { %1687 = vst.msk [vmem:[%s2499_s8 + $0x48] sm:$0xff] %vm1313_vm2, %v1671_v45  ;;  %v1662_v57 = vmax.f32 %v1646_v10, 0.0  ;;  %v1647_v27 = vadd.f32 %v3105_v8, %v1624_v51 }
 0x216   : > { %1678 = vst.msk [vmem:[%s2499_s8] sm:$0xff] %vm1313_vm2, %v1662_v57  ;;  %v1663_v59 = vmax.f32 %v1647_v27, 0.0 }
 0x218   : > { %1679 = vst.msk [vmem:[%s2499_s8 + $0x8] sm:$0xff] %vm1313_vm2, %v1663_v59 }
 0x227   : > { %v1593_v34 = vpop.f32.mrb[4].mxu1 }
 0x228   : > { %v1633_v36 = vmul.f32 %v3100_v2, %v1593_v34  ;;  %v1595_v25 = vpop.f32.mrb[5].mxu1 }
 0x229   : > { %v1596_v50 = vpop.f32.mrb[6].mxu1 }
 0x22a   : > { %v1656_v62 = vadd.f32 %v3105_v8, %v1633_v36  ;;  %v1634_v3 = vmul.f32 %v3100_v2, %v1596_v50  ;;  %v1598_v47 = vpop.f32.mrb[7].mxu1 }
 0x22b   : > { %v1561_v58 = vpop.f32.mrb[4].mxu0 }
 0x22c   : > { %v1672_v4 = vmax.f32 %v1656_v62, 0.0  ;;  %v1657_v5 = vadd.f32 %v3105_v8, %v1634_v3  ;;  %v1625_v26 = vmul.f32 %v3100_v2, %v1561_v58  ;;  %v1563_v23 = vpop.f32.mrb[5].mxu0 }
 0x22d   : > { %v1564_v9 = vpop.f32.mrb[6].mxu0 }
 0x22e   : > { %1688 = vst.msk [vmem:[%s2499_s8 + $0x50] sm:$0xff] %vm1313_vm2, %v1672_v4  ;;  %v1673_v33 = vmax.f32 %v1657_v5, 0.0  ;;  %v1648_v43 = vadd.f32 %v3105_v8, %v1625_v26  ;;  %v1626_v53 = vmul.f32 %v3100_v2, %v1564_v9  ;;  %v1566_v55 = vpop.f32.mrb[7].mxu0 }
 0x230   : > { %1689 = vst.msk [vmem:[%s2499_s8 + $0x58] sm:$0xff] %vm1313_vm2, %v1673_v33  ;;  %v1664_v30 = vmax.f32 %v1648_v43, 0.0  ;;  %v1649_v7 = vadd.f32 %v3105_v8, %v1626_v53 }
 0x232   : > { %1680 = vst.msk [vmem:[%s2499_s8 + $0x10] sm:$0xff] %vm1313_vm2, %v1664_v30  ;;  %v1665_v63 = vmax.f32 %v1649_v7, 0.0 }
 0x234   : > { %1681 = vst.msk [vmem:[%s2499_s8 + $0x18] sm:$0xff] %vm1313_vm2, %v1665_v63 }
 0x243   : > { %v1601_v56 = vpop.f32.mrb[8].mxu1 }
 0x244   : > { %v1635_v40 = vmul.f32 %v3100_v2, %v1601_v56  ;;  %v1603_v54 = vpop.f32.mrb[9].mxu1 }
 0x245   : > { %v1604_v39 = vpop.f32.mrb[10].mxu1 }
 0x246   : > { %v1658_v11 = vadd.f32 %v3105_v8, %v1635_v40  ;;  %v1636_v13 = vmul.f32 %v3100_v2, %v1604_v39  ;;  %v1606_v16 = vpop.f32.mrb[11].mxu1 }
 0x247   : > { %v1569_v24 = vpop.f32.mrb[8].mxu0 }
 0x248   : > { %v1674_v31 = vmax.f32 %v1658_v11, 0.0  ;;  %v1659_v17 = vadd.f32 %v3105_v8, %v1636_v13  ;;  %v1627_v18 = vmul.f32 %v3100_v2, %v1569_v24  ;;  %v1571_v19 = vpop.f32.mrb[9].mxu0 }
 0x249   : > { %v1572_v21 = vpop.f32.mrb[10].mxu0 }
 0x24a   : > { %1690 = vst.msk [vmem:[%s2499_s8 + $0x60] sm:$0xff] %vm1313_vm2, %v1674_v31  ;;  %v1675_v20 = vmax.f32 %v1659_v17, 0.0  ;;  %v1650_v6 = vadd.f32 %v3105_v8, %v1627_v18  ;;  %v1628_v60 = vmul.f32 %v3100_v2, %v1572_v21  ;;  %v1574_v46 = vpop.f32.mrb[11].mxu0 }
 0x24c   : > { %1691 = vst.msk [vmem:[%s2499_s8 + $0x68] sm:$0xff] %vm1313_vm2, %v1675_v20  ;;  %v1666_v22 = vmax.f32 %v1650_v6, 0.0  ;;  %v1651_v15 = vadd.f32 %v3105_v8, %v1628_v60 }
 0x24e   : > { %1682 = vst.msk [vmem:[%s2499_s8 + $0x20] sm:$0xff] %vm1313_vm2, %v1666_v22  ;;  %v1667_v28 = vmax.f32 %v1651_v15, 0.0 }
 0x250   : > { %1683 = vst.msk [vmem:[%s2499_s8 + $0x28] sm:$0xff] %vm1313_vm2, %v1667_v28 }
 0x25f   : > { %v1609_v52 = vpop.f32.mrb[12].mxu1 }
 0x260   : > { %v1637_v0 = vmul.f32 %v3100_v2, %v1609_v52  ;;  %v1611_v12 = vpop.f32.mrb[13].mxu1 }
 0x261   : > { %v1612_v35 = vpop.f32.mrb[14].mxu1 }
 0x262   : > { %v1660_v29 = vadd.f32 %v3105_v8, %v1637_v0  ;;  %v1638_v61 = vmul.f32 %v3100_v2, %v1612_v35  ;;  %v1614_v1 = vpop.f32.mrb[15].mxu1 }
 0x263   : > { %v1577_v38 = vpop.f32.mrb[12].mxu0 }
 0x264   : > { %v1676_v32 = vmax.f32 %v1660_v29, 0.0  ;;  %v1661_v41 = vadd.f32 %v3105_v8, %v1638_v61  ;;  %v1629_v48 = vmul.f32 %v3100_v2, %v1577_v38  ;;  %v1579_v14 = vpop.f32.mrb[13].mxu0 }
 0x265   : > { %v1580_v44 = vpop.f32.mrb[14].mxu0 }
 0x266   : > { %1692 = vst.msk [vmem:[%s2499_s8 + $0x70] sm:$0xff] %vm1313_vm2, %v1676_v32  ;;  %v1677_v42 = vmax.f32 %v1661_v41, 0.0  ;;  %v1652_v45 = vadd.f32 %v3105_v8, %v1629_v48  ;;  %v1630_v49 = vmul.f32 %v3100_v2, %v1580_v44  ;;  %v1582_v10 = vpop.f32.mrb[15].mxu0 }
 0x268   : > { %1693 = vst.msk [vmem:[%s2499_s8 + $0x78] sm:$0xff] %vm1313_vm2, %v1677_v42  ;;  %v1668_v51 = vmax.f32 %v1652_v45, 0.0  ;;  %v1653_v37 = vadd.f32 %v3105_v8, %v1630_v49 }
 0x26a   : > { %1684 = vst.msk [vmem:[%s2499_s8 + $0x30] sm:$0xff] %vm1313_vm2, %v1668_v51  ;;  %v1669_v2 = vmax.f32 %v1653_v37, 0.0 }
 0x26c   : > { %1685 = vst.msk [vmem:[%s2499_s8 + $0x38] sm:$0xff] %vm1313_vm2, %v1669_v2 }
 0x26d   : > { %2134 = shalt.err (!%p2131_p5)
}
 0x26e   : > { %s2135_s28 = scalar_lea.hbm %s3173_s30, 2048  ;;  %s2139_s10 = scalar_lea.hbm %s3248_s4, 8192 }
 0x26f   : > { %p2136_p8 = scmp.ne.s32.totalorder %s3173_s30, %s2135_s28  ;;  %p2140_p12 = scmp.lt.u32.totalorder %s3173_s30, %s3248_s4 }
 0x270   : > { %p2141_p2 = scmp.lt.u32.totalorder %s2139_s10, %s2135_s28  ;;  %p2143_p0 = scmp.lt.u32.totalorder %s2135_s28, %s3173_s30 }
 0x271   : > { %p2137_p10 = pnand %p2136_p8, %p3272_p1 }
 0x272   : > { %p2142_p4 = por %p2141_p2, %p2140_p12 }
 0x273   : > { %p2138_p7 = pneg %p2137_p10 }
 0x274   : > { %p2144_p6 = por %p2143_p0, %p2142_p4 }
 0x276   : > { %p2145_p9 = pnand %p2144_p6, %p2138_p7 }
 0x278   : > { %2148 = shalt.err (!%p2145_p9)
}
 0x279   : > { %s2259_s5 = smov 128   ;;  %s2260_s26 = smov 8  }
 0x27a   : > { %1958 = dma.vmem_to_hbm [thread:$0]  (%p3272_p1), %s3175_s22, 2048, %s3173_s30, %s3183_s18, %s2259_s5, %s2259_s5, %s2260_s26  }
 0x27b PF: > { %p1969_p3 = scmp.ge.s32.totalorder %s2243_s25, 2  ;;  %s1726_s9 = sand.u32 1, %s2203_s15  }
 0x27c   : > { %p3273_p11 = scmp.ne.s32.totalorder %s3257_s14, 0  ;;  %s1727_s29 = scalar_lea.sflag [#allocation5], %s1726_s9 }
 0x27e   : > { %p1965_p13 = pnand %p1969_p3, %p3273_p11 }
 0x280   : > { %2198 = dma.done.wait (!%p1965_p13), %s1727_s29, 2048  }
 0x281   : > { %2200 = vsyncadd (!%p1965_p13), %s1727_s29, 4294965248  ;;  %s20_s25 = sadd.s32 1, %s2243_s25   ;;  %s3274_s11 = sld [smem:[#allocation9_spill]] }
 0x282   : > { %p17_p5 = scmp.ge.s32.totalorder %s20_s25, 6   ;;  %s3275_s30 = sld [smem:[#allocation10_spill]] }
 0x283   : > { %s3276_s15 = smov %s2207_s16  ;;  %s3277_s16 = smov %s2211_s17 }
 0x284   : > { %s3278_s17 = smov %s2376_s13  ;;  %s3279_s18 = smov %s2219_s19 }
 0x285   : > { %s3280_s19 = smov %s2223_s20  ;;  %s3281_s20 = smov %s2373_s12 }
 0x286   : > { %s3282_s21 = smov %s2235_s23  ;;  %s3283_s22 = smov %s2239_s24 }
 0x287   : > { %s3284_s23 = smov %s3274_s11  ;;  %19 = sbr.rel (!%p17_p5) target bundleno = 9 (0x9), region = 103 }
 0x288   : > { %s3285_s24 = smov %s3275_s30 }
 0x28e   :  { %1732 = vsyncpa [#allocation4], 1 }
 0x28f   :  { %1734 = vsyncpa [#allocation4 + $0x1], 1 }
 0x290   :  { %1735 = vsyncpa [#allocation5], 1 }
 0x291   :  { %1737 = vsyncpa [#allocation5 + $0x1], 1 }

</bundles_post_ra>
